<compile_context>
chip_gen: v7x
topology: tpu7x:2x2x1
jax: 0.10.0
libtpu: 0.0.40
codegen_flags: <defaults>
</compile_context>

<pallas_src>
import functools

import jax
import jax.numpy as jnp
from jax.experimental import pallas as pl
from jax.experimental.pallas import tpu as pltpu


K1 = 28 * 28       # 784: layer-1 contraction dim (full last dim, no padding)
N4_PAD = 128       # padded output lanes for layer 4 (real outputs = 10)


def _mlp_kernel(x_ref,
                w1_ref, b1_ref,
                w2_ref, b2_ref,
                w3_ref, b3_ref,
                w4_ref, b4_ref,
                o_ref):
    """Fused 4-layer MLP for one batch tile. All operands resident in VMEM."""
    # x arrives straight from HBM as f32; cast to bf16 in-register (VPU) so the
    # wrapper never does a separate pad/cast HBM round trip.
    x = x_ref[...].astype(jnp.bfloat16)                               # (bm, 784)

    h = jnp.dot(x, w1_ref[...], preferred_element_type=jnp.float32)  # (bm, 512) f32
    h = jnp.maximum(h + b1_ref[...], 0.0).astype(jnp.bfloat16)

    h = jnp.dot(h, w2_ref[...], preferred_element_type=jnp.float32)  # (bm, 256) f32
    h = jnp.maximum(h + b2_ref[...], 0.0).astype(jnp.bfloat16)

    h = jnp.dot(h, w3_ref[...], preferred_element_type=jnp.float32)  # (bm, 128) f32
    h = jnp.maximum(h + b3_ref[...], 0.0).astype(jnp.bfloat16)

    h = jnp.dot(h, w4_ref[...], preferred_element_type=jnp.float32)  # (bm, 128) f32
    o_ref[...] = (h + b4_ref[...]).astype(o_ref.dtype)


def _round_up(n, m):
    return ((n + m - 1) // m) * m


def prepare_params(params):
    """One-time conversion of (in, out) f32 weights into the kernel layout.

    Call once at init / load time and reuse; avoids per-forward re-cast/pad."""
    (w1, b1), (w2, b2), (w3, b3), (w4, b4) = params
    w1p = jnp.asarray(w1, jnp.bfloat16)
    w2p = jnp.asarray(w2, jnp.bfloat16)
    w3p = jnp.asarray(w3, jnp.bfloat16)
    w4p = jnp.pad(w4, ((0, 0), (0, N4_PAD - w4.shape[1]))).astype(jnp.bfloat16)
    b1r = b1.reshape(1, -1).astype(jnp.float32)
    b2r = b2.reshape(1, -1).astype(jnp.float32)
    b3r = b3.reshape(1, -1).astype(jnp.float32)
    b4r = jnp.pad(b4, (0, N4_PAD - b4.shape[0])).reshape(1, -1).astype(jnp.float32)
    return (w1p, b1r, w2p, b2r, w3p, b3r, w4p, b4r)


@functools.partial(jax.jit, static_argnames=("bm",))
def dnn_forward(x_nchw, kernel_params, *, bm=512):
    """Forward pass matching DNN.forward.

    x_nchw: (B, 1, 28, 28) float32; kernel_params: output of prepare_params."""
    w1p, b1r, w2p, b2r, w3p, b3r, w4p, b4r = kernel_params

    # Glue: flatten exactly like x.view(-1, 28*28). No column pad, no cast here.
    x = x_nchw.reshape(-1, K1).astype(jnp.float32)
    B = x.shape[0]

    # Batch tile: cap at bm, but aim for >=2 grid steps when the batch is big
    # enough so both v7x TensorCores get work ("parallel" batch axis).
    half = _round_up(max(B // 2, 1), 16)
    bm_eff = max(16, min(bm, half))
    B_pad = _round_up(B, bm_eff)
    if B_pad != B:
        x = jnp.pad(x, ((0, B_pad - B), (0, 0)))  # zero rows only; cheap / no-op

    grid = (B_pad // bm_eff,)

    def full2(arr):
        # Whole-array block, same block index every grid step (resident weights).
        return pl.BlockSpec(arr.shape, lambda i: (0, 0))

    out = pl.pallas_call(
        _mlp_kernel,
        out_shape=jax.ShapeDtypeStruct((B_pad, N4_PAD), jnp.float32),
        grid_spec=pltpu.PrefetchScalarGridSpec(
            num_scalar_prefetch=0,
            grid=grid,
            in_specs=[
                pl.BlockSpec((bm_eff, K1), lambda i: (i, 0)),   # streaming x tile
                full2(w1p), full2(b1r),
                full2(w2p), full2(b2r),
                full2(w3p), full2(b3r),
                full2(w4p), full2(b4r),
            ],
            out_specs=pl.BlockSpec((bm_eff, N4_PAD), lambda i: (i, 0)),
        ),
        compiler_params=pltpu.CompilerParams(
            dimension_semantics=("parallel",),
            vmem_limit_bytes=48 * 1024 * 1024,  # > v5e's 16 MiB default, < v7x 64 MiB
        ),
    )(x, w1p, b1r, w2p, b2r, w3p, b3r, w4p, b4r)

    # Drop batch padding and the 118 padded output lanes.
    return out[:B, :10]


def init_params(key):
    """Deterministic init mimicking nn.Linear default U(-1/sqrt(fan_in), ...).

    Weights are stored as (in_features, out_features)."""
    dims = [(28 * 28, 512), (512, 256), (256, 128), (128, 10)]
    params = []
    for (fan_in, fan_out) in dims:
        key, kw, kb = jax.random.split(key, 3)
        bound = 1.0 / jnp.sqrt(fan_in)
        w = jax.random.uniform(kw, (fan_in, fan_out), jnp.float32, -bound, bound)
        b = jax.random.uniform(kb, (fan_out,), jnp.float32, -bound, bound)
        params.append((w, b))
    return params


def _reference_f32(x_nchw, params):
    """Pure-f32 JAX reference of the PyTorch module."""
    (w1, b1), (w2, b2), (w3, b3), (w4, b4) = params
    x = x_nchw.reshape(-1, K1)
    h = jnp.maximum(x @ w1 + b1, 0.0)
    h = jnp.maximum(h @ w2 + b2, 0.0)
    h = jnp.maximum(h @ w3 + b3, 0.0)
    return h @ w4 + b4


def _reference_bf16(x_nchw, params):
    """JAX reference matching the kernel's bf16-operand / f32-accumulate math."""
    h = x_nchw.reshape(-1, K1).astype(jnp.bfloat16)
    for li, (w, b) in enumerate(params):
        acc = jnp.dot(h, w.astype(jnp.bfloat16),
                      preferred_element_type=jnp.float32) + b.astype(jnp.float32)
        if li < len(params) - 1:
            h = jnp.maximum(acc, 0.0).astype(jnp.bfloat16)
        else:
            h = acc
    return h


if __name__ == "__main__":
    key = jax.random.PRNGKey(0)
    kp, kx, kx2 = jax.random.split(key, 3)

    params = init_params(kp)
    kparams = prepare_params(params)  # one-time weight cast/pad (cached layout)

    # Small batch of "MNIST-like" NCHW images.
    x = jax.random.normal(kx, (2, 1, 28, 28), dtype=jnp.float32)

    out = dnn_forward(x, kparams)
    out = jax.block_until_ready(out)
    assert out.shape == (2, 10), out.shape

    # Tight-ish check vs a reference that uses the same bf16-operand math.
    ref_bf16 = _reference_bf16(x, params)
    assert jnp.allclose(out, ref_bf16, atol=1e-2, rtol=1e-2), "mismatch vs bf16 reference"

    # Loose check vs the full-f32 PyTorch-equivalent reference (bf16 rounding).
    ref_f32 = _reference_f32(x, params)
    assert jnp.allclose(out, ref_f32, atol=1e-1, rtol=1e-1), "mismatch vs f32 reference"

    # Secondary check with a batch that is not a tile multiple (exercises a
    # multi-step grid and the batch-row padding path).
    x2 = jax.random.normal(kx2, (40, 1, 28, 28), dtype=jnp.float32)
    out2 = jax.block_until_ready(dnn_forward(x2, kparams))
    assert out2.shape == (40, 10), out2.shape
    assert jnp.allclose(out2, _reference_bf16(x2, params), atol=1e-2, rtol=1e-2)

    print("KERNEL_OK")
</pallas_src>

<mosaic_0001>
module attributes {stable_mosaic.version = 11 : i64} {
  func.func @_mlp_kernel(%arg0: i32, %arg1: memref<16x784xf32, #tpu.memory_space<vmem>>, %arg2: memref<784x512xbf16, #tpu.memory_space<vmem>>, %arg3: memref<1x512xf32, #tpu.memory_space<vmem>>, %arg4: memref<512x256xbf16, #tpu.memory_space<vmem>>, %arg5: memref<1x256xf32, #tpu.memory_space<vmem>>, %arg6: memref<256x128xbf16, #tpu.memory_space<vmem>>, %arg7: memref<1x128xf32, #tpu.memory_space<vmem>>, %arg8: memref<128x128xbf16, #tpu.memory_space<vmem>>, %arg9: memref<1x128xf32, #tpu.memory_space<vmem>>, %arg10: memref<16x128xf32, #tpu.memory_space<vmem>>) attributes {dimension_semantics = [#tpu.dimension_semantics<parallel>], iteration_bounds = array<i64: 1>, scalar_prefetch = 0 : i64, scratch_operands = 0 : i64, tpu.core_type = #tpu.core_type<tc>, window_params = [{transform_indices = @transform_0, window_bounds = array<i64: 16, 784>}, {pipeline_mode = #tpu.pipeline_mode<synchronous>, transform_indices = @transform_1, window_bounds = array<i64: 784, 512>}, {pipeline_mode = #tpu.pipeline_mode<synchronous>, transform_indices = @transform_2, window_bounds = array<i64: 1, 512>}, {pipeline_mode = #tpu.pipeline_mode<synchronous>, transform_indices = @transform_3, window_bounds = array<i64: 512, 256>}, {pipeline_mode = #tpu.pipeline_mode<synchronous>, transform_indices = @transform_4, window_bounds = array<i64: 1, 256>}, {pipeline_mode = #tpu.pipeline_mode<synchronous>, transform_indices = @transform_5, window_bounds = array<i64: 256, 128>}, {pipeline_mode = #tpu.pipeline_mode<synchronous>, transform_indices = @transform_6, window_bounds = array<i64: 1, 128>}, {pipeline_mode = #tpu.pipeline_mode<synchronous>, transform_indices = @transform_7, window_bounds = array<i64: 128, 128>}, {pipeline_mode = #tpu.pipeline_mode<synchronous>, transform_indices = @transform_8, window_bounds = array<i64: 1, 128>}, {transform_indices = @transform_9, window_bounds = array<i64: 16, 128>}]} {
    %c0 = arith.constant 0 : index
    %c0_0 = arith.constant 0 : index
    %0 = vector.load %arg1[%c0, %c0_0] : memref<16x784xf32, #tpu.memory_space<vmem>>, vector<16x784xf32>
    %1 = arith.truncf %0 : vector<16x784xf32> to vector<16x784xbf16>
    %c0_1 = arith.constant 0 : index
    %c0_2 = arith.constant 0 : index
    %2 = vector.load %arg2[%c0_1, %c0_2] : memref<784x512xbf16, #tpu.memory_space<vmem>>, vector<784x512xbf16>
    %cst = arith.constant dense<0.000000e+00> : vector<16x512xf32>
    %3 = tpu.matmul %1, %2, %cst {dimension_numbers = #tpu.dot_dimension_numbers<[1], [0], [0], [1], [0, 0, 1, 1], [], []>} : vector<16x784xbf16>, vector<784x512xbf16>, vector<16x512xf32> -> vector<16x512xf32>
    %c0_3 = arith.constant 0 : index
    %c0_4 = arith.constant 0 : index
    %4 = vector.load %arg3[%c0_3, %c0_4] : memref<1x512xf32, #tpu.memory_space<vmem>>, vector<1x512xf32>
    %5 = vector.broadcast %4 : vector<1x512xf32> to vector<16x512xf32>
    %6 = arith.addf %3, %5 : vector<16x512xf32>
    %cst_5 = arith.constant 0.000000e+00 : f32
    %7 = vector.broadcast %cst_5 : f32 to vector<16x512xf32>
    %8 = arith.maximumf %6, %7 : vector<16x512xf32>
    %9 = arith.truncf %8 : vector<16x512xf32> to vector<16x512xbf16>
    %c0_6 = arith.constant 0 : index
    %c0_7 = arith.constant 0 : index
    %10 = vector.load %arg4[%c0_6, %c0_7] : memref<512x256xbf16, #tpu.memory_space<vmem>>, vector<512x256xbf16>
    %cst_8 = arith.constant dense<0.000000e+00> : vector<16x256xf32>
    %11 = tpu.matmul %9, %10, %cst_8 {dimension_numbers = #tpu.dot_dimension_numbers<[1], [0], [0], [1], [0, 0, 1, 1], [], []>} : vector<16x512xbf16>, vector<512x256xbf16>, vector<16x256xf32> -> vector<16x256xf32>
    %c0_9 = arith.constant 0 : index
    %c0_10 = arith.constant 0 : index
    %12 = vector.load %arg5[%c0_9, %c0_10] : memref<1x256xf32, #tpu.memory_space<vmem>>, vector<1x256xf32>
    %13 = vector.broadcast %12 : vector<1x256xf32> to vector<16x256xf32>
    %14 = arith.addf %11, %13 : vector<16x256xf32>
    %cst_11 = arith.constant 0.000000e+00 : f32
    %15 = vector.broadcast %cst_11 : f32 to vector<16x256xf32>
    %16 = arith.maximumf %14, %15 : vector<16x256xf32>
    %17 = arith.truncf %16 : vector<16x256xf32> to vector<16x256xbf16>
    %c0_12 = arith.constant 0 : index
    %c0_13 = arith.constant 0 : index
    %18 = vector.load %arg6[%c0_12, %c0_13] : memref<256x128xbf16, #tpu.memory_space<vmem>>, vector<256x128xbf16>
    %cst_14 = arith.constant dense<0.000000e+00> : vector<16x128xf32>
    %19 = tpu.matmul %17, %18, %cst_14 {dimension_numbers = #tpu.dot_dimension_numbers<[1], [0], [0], [1], [0, 0, 1, 1], [], []>} : vector<16x256xbf16>, vector<256x128xbf16>, vector<16x128xf32> -> vector<16x128xf32>
    %c0_15 = arith.constant 0 : index
    %c0_16 = arith.constant 0 : index
    %20 = vector.load %arg7[%c0_15, %c0_16] : memref<1x128xf32, #tpu.memory_space<vmem>>, vector<1x128xf32>
    %21 = vector.broadcast %20 : vector<1x128xf32> to vector<16x128xf32>
    %22 = arith.addf %19, %21 : vector<16x128xf32>
    %cst_17 = arith.constant 0.000000e+00 : f32
    %23 = vector.broadcast %cst_17 : f32 to vector<16x128xf32>
    %24 = arith.maximumf %22, %23 : vector<16x128xf32>
    %25 = arith.truncf %24 : vector<16x128xf32> to vector<16x128xbf16>
    %c0_18 = arith.constant 0 : index
    %c0_19 = arith.constant 0 : index
    %26 = vector.load %arg8[%c0_18, %c0_19] : memref<128x128xbf16, #tpu.memory_space<vmem>>, vector<128x128xbf16>
    %cst_20 = arith.constant dense<0.000000e+00> : vector<16x128xf32>
    %27 = tpu.matmul %25, %26, %cst_20 {dimension_numbers = #tpu.dot_dimension_numbers<[1], [0], [0], [1], [0, 0, 1, 1], [], []>} : vector<16x128xbf16>, vector<128x128xbf16>, vector<16x128xf32> -> vector<16x128xf32>
    %c0_21 = arith.constant 0 : index
    %c0_22 = arith.constant 0 : index
    %28 = vector.load %arg9[%c0_21, %c0_22] : memref<1x128xf32, #tpu.memory_space<vmem>>, vector<1x128xf32>
    %29 = vector.broadcast %28 : vector<1x128xf32> to vector<16x128xf32>
    %30 = arith.addf %27, %29 : vector<16x128xf32>
    %c0_23 = arith.constant 0 : index
    %c0_24 = arith.constant 0 : index
    %31 = vector.load %arg10[%c0_23, %c0_24] : memref<16x128xf32, #tpu.memory_space<vmem>>, vector<16x128xf32>
    tpu.vector_store %arg10[%c0_23, %c0_24], %30 {strides = array<i32>} : memref<16x128xf32, #tpu.memory_space<vmem>>, vector<16x128xf32>,
    return
  }
  func.func @transform_0(%arg0: i32) -> (i32, i32) {
    %c0_i32 = arith.constant 0 : i32
    %c0_i32_0 = arith.constant 0 : i32
    return %arg0, %c0_i32 : i32, i32
  }
  func.func @transform_1(%arg0: i32) -> (i32, i32) {
    %c0_i32 = arith.constant 0 : i32
    %c0_i32_0 = arith.constant 0 : i32
    %c0_i32_1 = arith.constant 0 : i32
    return %c0_i32, %c0_i32_0 : i32, i32
  }
  func.func @transform_2(%arg0: i32) -> (i32, i32) {
    %c0_i32 = arith.constant 0 : i32
    %c0_i32_0 = arith.constant 0 : i32
    %c0_i32_1 = arith.constant 0 : i32
    return %c0_i32, %c0_i32_0 : i32, i32
  }
  func.func @transform_3(%arg0: i32) -> (i32, i32) {
    %c0_i32 = arith.constant 0 : i32
    %c0_i32_0 = arith.constant 0 : i32
    %c0_i32_1 = arith.constant 0 : i32
    return %c0_i32, %c0_i32_0 : i32, i32
  }
  func.func @transform_4(%arg0: i32) -> (i32, i32) {
    %c0_i32 = arith.constant 0 : i32
    %c0_i32_0 = arith.constant 0 : i32
    %c0_i32_1 = arith.constant 0 : i32
    return %c0_i32, %c0_i32_0 : i32, i32
  }
  func.func @transform_5(%arg0: i32) -> (i32, i32) {
    %c0_i32 = arith.constant 0 : i32
    %c0_i32_0 = arith.constant 0 : i32
    %c0_i32_1 = arith.constant 0 : i32
    return %c0_i32, %c0_i32_0 : i32, i32
  }
  func.func @transform_6(%arg0: i32) -> (i32, i32) {
    %c0_i32 = arith.constant 0 : i32
    %c0_i32_0 = arith.constant 0 : i32
    %c0_i32_1 = arith.constant 0 : i32
    return %c0_i32, %c0_i32_0 : i32, i32
  }
  func.func @transform_7(%arg0: i32) -> (i32, i32) {
    %c0_i32 = arith.constant 0 : i32
    %c0_i32_0 = arith.constant 0 : i32
    %c0_i32_1 = arith.constant 0 : i32
    return %c0_i32, %c0_i32_0 : i32, i32
  }
  func.func @transform_8(%arg0: i32) -> (i32, i32) {
    %c0_i32 = arith.constant 0 : i32
    %c0_i32_0 = arith.constant 0 : i32
    %c0_i32_1 = arith.constant 0 : i32
    return %c0_i32, %c0_i32_0 : i32, i32
  }
  func.func @transform_9(%arg0: i32) -> (i32, i32) {
    %c0_i32 = arith.constant 0 : i32
    %c0_i32_0 = arith.constant 0 : i32
    return %arg0, %c0_i32 : i32, i32
  }
}

</mosaic_0001>

<bundles_post_ra>
// kernel: dnn_forward.1
= control target key start
LH: loop header
LB: loop body
LE: loop exit
PB: predicated region body
PF: predicated region fallthrough
CT: control target
= control target key end

     0   :  { %14 = vsyncpa [#allocation3], 0  ;;  %s3526_s0 = inlined_call_operand.vmem [shape: f32[16,784], index: 0, kind: input, shape index: {}]   ;;  %s3527_s1 = inlined_call_operand.hbm [shape: bf16[784,512], index: 1, kind: input, shape index: {}]   ;;  %s3528_s2 = inlined_call_operand.vmem [shape: f32[1,512], index: 2, kind: input, shape index: {}]   ;;  %s3529_s3 = inlined_call_operand.hbm [shape: bf16[512,256], index: 3, kind: input, shape index: {}]   ;;  %s3530_s4 = inlined_call_operand.vmem [shape: f32[1,256], index: 4, kind: input, shape index: {}]   ;;  %s3531_s5 = inlined_call_operand.vmem [shape: bf16[256,128], index: 5, kind: input, shape index: {}]   ;;  %s3532_s6 = inlined_call_operand.vmem [shape: f32[1,128], index: 6, kind: input, shape index: {}]   ;;  %s3533_s7 = inlined_call_operand.vmem [shape: bf16[128,128], index: 7, kind: input, shape index: {}]   ;;  %s3534_s8 = inlined_call_operand.vmem [shape: f32[1,128], index: 8, kind: input, shape index: {}]   ;;  %s3535_s9 = inlined_call_operand.vmem [shape: f32[16,128], index: 9, kind: output, shape index: {}]  }
   0x1   :  { %15 = vsyncpa [#allocation5], 0  ;;  %s3277_s30 = smov [#allocation2]   ;;  %s3229_s13 = scalar_lea.hbm %s3527_s1, 25088 }
   0x2   :  { %s23_s10 = sshll.u32 %s3277_s30, 4  ;;  %p3230_p0 = scmp.ne.s32.totalorder %s3527_s1, %s3229_s13  ;;  %s24_s10 = int_to_ptr.vmem [resolvable:$true] %s23_s10 }
   0x3   :  { %p3233_p1 = scmp.lt.u32.totalorder %s3229_s13, %s3527_s1 }
   0x5   :  { %p3235_p2 = pnand %p3233_p1, %p3230_p0 }
   0x7   :  { %3238 = shalt.err (!%p3235_p2)
}
   0x8   :  { %s3239_s18 = scalar_lea.vmem %s24_s10, 25088  ;;  %p3244_p4 = scmp.lt.s32.totalorder %s24_s10, %s24_s10 }
   0x9   :  { %p3240_p3 = scmp.ne.s32.totalorder %s24_s10, %s3239_s18  ;;  %p3245_p5 = scmp.lt.s32.totalorder %s3239_s18, %s3239_s18 }
   0xb   :  { %p3246_p6 = por %p3245_p5, %p3244_p4 }
   0xd   :  { %p3247_p7 = pnand %p3246_p6, %p3240_p3 }
   0xf   :  { %3250 = shalt.err (!%p3247_p7)
}
  0x10   :  { %s3278_s19 = smov 256   ;;  %s3279_s20 = smov 16  }
  0x11   :  { %29 = dma.hbm_to_vmem [thread:$0]  %s3527_s1, 25088, %s24_s10, [#allocation3], %s3278_s19, %s3278_s19, %s3279_s20  }
  0x12   :  { %s3280_s23 = smov [#allocation4]   ;;  %s3251_s27 = scalar_lea.hbm %s3529_s3, 8192 }
  0x13   :  { %s37_s24 = sshll.u32 %s3280_s23, 4  ;;  %p3252_p8 = scmp.ne.s32.totalorder %s3529_s3, %s3251_s27  ;;  %s38_s24 = int_to_ptr.vmem [resolvable:$true] %s37_s24 }
  0x14   :  { %p3255_p9 = scmp.lt.u32.totalorder %s3251_s27, %s3529_s3 }
  0x16   :  { %p3257_p10 = pnand %p3255_p9, %p3252_p8 }
  0x18   :  { %3260 = shalt.err (!%p3257_p10)
}
  0x19   :  { %s3261_s12 = scalar_lea.vmem %s38_s24, 8192  ;;  %p3266_p12 = scmp.lt.s32.totalorder %s38_s24, %s38_s24 }
  0x1a   :  { %p3262_p11 = scmp.ne.s32.totalorder %s38_s24, %s3261_s12  ;;  %p3267_p13 = scmp.lt.s32.totalorder %s3261_s12, %s3261_s12 }
  0x1c   :  { %p3268_p0 = por %p3267_p13, %p3266_p12 }
  0x1e   :  { %p3269_p1 = pnand %p3268_p0, %p3262_p11 }
  0x20   :  { %3272 = shalt.err (!%p3269_p1)
}
  0x21   :  { %s3281_s1 = smov 128   ;;  %s3282_s10 = smov 8  }
  0x22   :  { %43 = dma.hbm_to_vmem [thread:$0]  %s3529_s3, 8192, %s38_s24, [#allocation5], %s3281_s1, %s3281_s1, %s3282_s10  }
  0x23   :  { %3273 = dma.done.wait [#allocation3], 25088  }
  0x24   :  { %3274 = vsyncadd [#allocation3], 4294942208 }
  0x25   :  { %3275 = dma.done.wait [#allocation5], 8192  }
  0x26   :  { %3276 = vsyncadd [#allocation5], 4294959104  ;;  %v3283_v0 = vmov 0   ;;  %v2815_v1 = vld [vmem:[#allocation2 + $0x4] ss:$16 sps:$4 sm:$0xff]   ;;  %v74_v10 = vld [vmem:[%s3526_s0 + $0x68] sm:$0xff] }
  0x27   :  { %1445 = vmatprep.mubr.bf16.mxu1 %v3283_v0  ;;  %v2817_v2 = vld [vmem:[#allocation2 + $0x604] ss:$16 sps:$4 sm:$0xff]   ;;  %1284 = vmatprep.subr.bf16.mxu0 %v2815_v1  ;;  %v2819_v3 = vld [vmem:[#allocation2] ss:$16 sps:$4 sm:$0xff]   ;;  %v2823_v6 = vld [vmem:[#allocation2 + $0x8] ss:$16 sps:$4 sm:$0xff]  }
  0x28   :  { %v2820_v4 = vld [vmem:[#allocation2 + $0x600] ss:$16 sps:$4 sm:$0xff]   ;;  %1413 = vmatprep.subr.bf16.mxu1 %v2817_v2  ;;  %v2821_v5 = vld [vmem:[#allocation2 + $0x24] ss:$16 sps:$4 sm:$0xff]   ;;  %1285 = vmatpush1.bf16.msra.mxu0 %v2819_v3  ;;  %v2825_v7 = vld [vmem:[#allocation2 + $0xc] ss:$16 sps:$4 sm:$0xff]  }
  0x29   :  { %1414 = vmatpush1.bf16.msra.mxu1 %v2820_v4  ;;  %1286 = vmatprep.subr.bf16.mxu0 %v2821_v5  ;;  %v2826_v8 = vld [vmem:[#allocation2 + $0x20] ss:$16 sps:$4 sm:$0xff]   ;;  %vm1280_vm0 = vcmask 130048   ;;  %v2827_v12 = vld [vmem:[#allocation2 + $0x44] ss:$16 sps:$4 sm:$0xff]   ;;  %v62_v51 = vld [vmem:[%s3526_s0 + $0x8] sm:$0xff] }
  0x2a   :  { %v67_v9 = vld [vmem:[%s3526_s0 + $0x30] sm:$0xff]  ;;  %1456 = vmatprep.subr.bf16.mxu1 %v2825_v7  ;;  %v2829_v13 = vld [vmem:[#allocation2 + $0x28] ss:$16 sps:$4 sm:$0xff]   ;;  %v2831_v14 = vld [vmem:[#allocation2 + $0x2c] ss:$16 sps:$4 sm:$0xff]   ;;  %vm3285_vm1 = vmmov 0  }
  0x2b   :  { %v3367_v11 = vpack.c.bf16 %v74_v10, %v67_v9  ;;  %v2832_v15 = vld [vmem:[#allocation2 + $0x40] ss:$16 sps:$4 sm:$0xff]   ;;  %v2833_v16 = vld [vmem:[#allocation2 + $0x64] ss:$16 sps:$4 sm:$0xff]   ;;  %v2837_v17 = vld [vmem:[#allocation2 + $0x4c] ss:$16 sps:$4 sm:$0xff]  }
  0x2c   :  { %1287 = vmatpush1.bf16.msra.mxu0 %v2826_v8  ;;  %v2838_v18 = vld [vmem:[#allocation2 + $0x60] ss:$16 sps:$4 sm:$0xff]   ;;  %v2835_v19 = vld [vmem:[#allocation2 + $0x48] ss:$16 sps:$4 sm:$0xff]   ;;  %v2839_v20 = vld [vmem:[#allocation2 + $0x84] ss:$16 sps:$4 sm:$0xff]  }
  0x2d   :  { %2623 = vmatmul.mubr.msk.bf16.vlgmr.msra.gmra.mrb[0].mxu1 %vm1280_vm0, %v3367_v11  ;;  %1288 = vmatprep.subr.bf16.mxu0 %v2827_v12  ;;  %v2843_v21 = vld [vmem:[#allocation2 + $0x6c] ss:$16 sps:$4 sm:$0xff]   ;;  %v2841_v22 = vld [vmem:[#allocation2 + $0x68] ss:$16 sps:$4 sm:$0xff]   ;;  %v2844_v23 = vld [vmem:[#allocation2 + $0x80] ss:$16 sps:$4 sm:$0xff]  }
  0x2e   :  { %1457 = vmatpush1.bf16.msra.mxu1 %v2823_v6  ;;  %v2845_v24 = vld [vmem:[#allocation2 + $0xa4] ss:$16 sps:$4 sm:$0xff]   ;;  %v2849_v25 = vld [vmem:[#allocation2 + $0x8c] ss:$16 sps:$4 sm:$0xff]   ;;  %v2850_v26 = vld [vmem:[#allocation2 + $0xa0] ss:$16 sps:$4 sm:$0xff]  }
  0x2f   :  { %1458 = vmatprep.subr.bf16.mxu1 %v2831_v14  ;;  %v2847_v27 = vld [vmem:[#allocation2 + $0x88] ss:$16 sps:$4 sm:$0xff]   ;;  %v2851_v28 = vld [vmem:[#allocation2 + $0xc4] ss:$16 sps:$4 sm:$0xff]   ;;  %v2855_v29 = vld [vmem:[#allocation2 + $0xac] ss:$16 sps:$4 sm:$0xff]  }
  0x30   :  { %1289 = vmatpush1.bf16.msra.mxu0 %v2832_v15  ;;  %v2853_v30 = vld [vmem:[#allocation2 + $0xa8] ss:$16 sps:$4 sm:$0xff]   ;;  %v2856_v31 = vld [vmem:[#allocation2 + $0xc0] ss:$16 sps:$4 sm:$0xff]   ;;  %v2857_v32 = vld [vmem:[#allocation2 + $0xe4] ss:$16 sps:$4 sm:$0xff]  }
  0x31   :  { %1290 = vmatprep.subr.bf16.mxu0 %v2833_v16  ;;  %v2861_v33 = vld [vmem:[#allocation2 + $0xcc] ss:$16 sps:$4 sm:$0xff]   ;;  %v2862_v34 = vld [vmem:[#allocation2 + $0xe0] ss:$16 sps:$4 sm:$0xff]   ;;  %v2859_v35 = vld [vmem:[#allocation2 + $0xc8] ss:$16 sps:$4 sm:$0xff]  }
  0x32   :  { %1459 = vmatpush1.bf16.msra.mxu1 %v2829_v13  ;;  %v2863_v36 = vld [vmem:[#allocation2 + $0x104] ss:$16 sps:$4 sm:$0xff]   ;;  %v2867_v37 = vld [vmem:[#allocation2 + $0xec] ss:$16 sps:$4 sm:$0xff]   ;;  %v2865_v38 = vld [vmem:[#allocation2 + $0xe8] ss:$16 sps:$4 sm:$0xff]  }
  0x33   :  { %1460 = vmatprep.subr.bf16.mxu1 %v2837_v17  ;;  %v2868_v39 = vld [vmem:[#allocation2 + $0x100] ss:$16 sps:$4 sm:$0xff]   ;;  %v2869_v40 = vld [vmem:[#allocation2 + $0x124] ss:$16 sps:$4 sm:$0xff]   ;;  %v2873_v41 = vld [vmem:[#allocation2 + $0x10c] ss:$16 sps:$4 sm:$0xff]  }
  0x34   :  { %1291 = vmatpush1.bf16.msra.mxu0 %v2838_v18  ;;  %v2874_v42 = vld [vmem:[#allocation2 + $0x120] ss:$16 sps:$4 sm:$0xff]   ;;  %v2871_v43 = vld [vmem:[#allocation2 + $0x108] ss:$16 sps:$4 sm:$0xff]   ;;  %v2875_v44 = vld [vmem:[#allocation2 + $0x144] ss:$16 sps:$4 sm:$0xff]  }
  0x35   :  { %1292 = vmatprep.subr.bf16.mxu0 %v2839_v20  ;;  %v2879_v45 = vld [vmem:[#allocation2 + $0x12c] ss:$16 sps:$4 sm:$0xff]   ;;  %v2877_v46 = vld [vmem:[#allocation2 + $0x128] ss:$16 sps:$4 sm:$0xff]   ;;  %v2880_v47 = vld [vmem:[#allocation2 + $0x140] ss:$16 sps:$4 sm:$0xff]  }
  0x36   :  { %1461 = vmatpush1.bf16.msra.mxu1 %v2835_v19  ;;  %v2881_v48 = vld [vmem:[#allocation2 + $0x164] ss:$16 sps:$4 sm:$0xff]   ;;  %v2885_v49 = vld [vmem:[#allocation2 + $0x14c] ss:$16 sps:$4 sm:$0xff]   ;;  %v2883_v50 = vld [vmem:[#allocation2 + $0x148] ss:$16 sps:$4 sm:$0xff]  }
  0x37   :  { %1462 = vmatprep.subr.bf16.mxu1 %v2843_v21  ;;  %v69_v52 = vld [vmem:[%s3526_s0 + $0x40] sm:$0xff]  ;;  %v2891_v56 = vld [vmem:[#allocation2 + $0x16c] ss:$16 sps:$4 sm:$0xff]   ;;  %v2889_v58 = vld [vmem:[#allocation2 + $0x168] ss:$16 sps:$4 sm:$0xff]  }
  0x38   :  { %1293 = vmatpush1.bf16.msra.mxu0 %v2844_v23  ;;  %v2886_v53 = vld [vmem:[#allocation2 + $0x160] ss:$16 sps:$4 sm:$0xff]   ;;  %v76_v54 = vpack.c.bf16 %v69_v52, %v62_v51  ;;  %v2887_v55 = vld [vmem:[#allocation2 + $0x184] ss:$16 sps:$4 sm:$0xff]   ;;  %v2897_v60 = vld [vmem:[#allocation2 + $0x18c] ss:$16 sps:$4 sm:$0xff]  }
  0x39   :  { %1294 = vmatprep.subr.bf16.mxu0 %v2845_v24  ;;  %v2892_v57 = vld [vmem:[#allocation2 + $0x180] ss:$16 sps:$4 sm:$0xff]   ;;  %v2893_v59 = vld [vmem:[#allocation2 + $0x1a4] ss:$16 sps:$4 sm:$0xff]   ;;  %v2895_v62 = vld [vmem:[#allocation2 + $0x188] ss:$16 sps:$4 sm:$0xff]  }
  0x3a   :  { %1463 = vmatpush1.bf16.msra.mxu1 %v2841_v22  ;;  %1316 = vmatprep.mubr.bf16.mxu0 %v76_v54  ;;  %v2898_v61 = vld [vmem:[#allocation2 + $0x1a0] ss:$16 sps:$4 sm:$0xff]   ;;  %v2899_v63 = vld [vmem:[#allocation2 + $0x1c4] ss:$16 sps:$4 sm:$0xff]   ;;  %v2903_v1 = vld [vmem:[#allocation2 + $0x1ac] ss:$16 sps:$4 sm:$0xff]  }
  0x3b   :  { %1464 = vmatprep.subr.bf16.mxu1 %v2849_v25  ;;  %1488 = vmatprep.mubr.bf16.mxu1 %v76_v54  ;;  %v2904_v2 = vld [vmem:[#allocation2 + $0x1c0] ss:$16 sps:$4 sm:$0xff]   ;;  %v2901_v3 = vld [vmem:[#allocation2 + $0x1a8] ss:$16 sps:$4 sm:$0xff]   ;;  %v2905_v4 = vld [vmem:[#allocation2 + $0x1e4] ss:$16 sps:$4 sm:$0xff]  }
  0x3c   :  { %1295 = vmatpush1.bf16.msra.mxu0 %v2850_v26  ;;  %v2909_v5 = vld [vmem:[#allocation2 + $0x1cc] ss:$16 sps:$4 sm:$0xff]   ;;  %v2910_v6 = vld [vmem:[#allocation2 + $0x1e0] ss:$16 sps:$4 sm:$0xff]   ;;  %v2907_v9 = vld [vmem:[#allocation2 + $0x1c8] ss:$16 sps:$4 sm:$0xff]  }
  0x3d   :  { %1296 = vmatprep.subr.bf16.mxu0 %v2851_v28  ;;  %v61_v7 = vld [vmem:[%s3526_s0] sm:$0xff]  ;;  %v68_v8 = vld [vmem:[%s3526_s0 + $0x38] sm:$0xff] }
  0x3e   :  { %1465 = vmatpush1.bf16.msra.mxu1 %v2847_v27  ;;  %v2913_v10 = vld [vmem:[#allocation2 + $0x204] ss:$16 sps:$4 sm:$0xff]   ;;  %v2916_v12 = vld [vmem:[#allocation2 + $0x1ec] ss:$16 sps:$4 sm:$0xff]   ;;  %v75_v13 = vpack.c.bf16 %v68_v8, %v61_v7  ;;  %v2911_v14 = vld [vmem:[#allocation2 + $0x200] ss:$16 sps:$4 sm:$0xff]  }
  0x3f   :  { %1466 = vmatprep.subr.bf16.mxu1 %v2855_v29  ;;  %v2914_v15 = vld [vmem:[#allocation2 + $0x1e8] ss:$16 sps:$4 sm:$0xff]   ;;  %v2919_v16 = vld [vmem:[#allocation2 + $0x224] ss:$16 sps:$4 sm:$0xff]   ;;  %v2922_v17 = vld [vmem:[#allocation2 + $0x20c] ss:$16 sps:$4 sm:$0xff]  }
  0x40   :  { %1297 = vmatpush1.bf16.msra.mxu0 %v2856_v31  ;;  %v2917_v18 = vld [vmem:[#allocation2 + $0x220] ss:$16 sps:$4 sm:$0xff]   ;;  %v2920_v19 = vld [vmem:[#allocation2 + $0x208] ss:$16 sps:$4 sm:$0xff]   ;;  %v2925_v20 = vld [vmem:[#allocation2 + $0x244] ss:$16 sps:$4 sm:$0xff]  }
  0x41   :  { %1298 = vmatprep.subr.bf16.mxu0 %v2857_v32  ;;  %v2928_v21 = vld [vmem:[#allocation2 + $0x22c] ss:$16 sps:$4 sm:$0xff]   ;;  %v2923_v22 = vld [vmem:[#allocation2 + $0x240] ss:$16 sps:$4 sm:$0xff]   ;;  %v2926_v23 = vld [vmem:[#allocation2 + $0x228] ss:$16 sps:$4 sm:$0xff]  }
  0x42   :  { %1467 = vmatpush1.bf16.msra.mxu1 %v2853_v30  ;;  %v2931_v24 = vld [vmem:[#allocation2 + $0x264] ss:$16 sps:$4 sm:$0xff]   ;;  %v2934_v25 = vld [vmem:[#allocation2 + $0x24c] ss:$16 sps:$4 sm:$0xff]   ;;  %v2929_v26 = vld [vmem:[#allocation2 + $0x260] ss:$16 sps:$4 sm:$0xff]  }
  0x43   :  { %1468 = vmatprep.subr.bf16.mxu1 %v2861_v33  ;;  %v2932_v27 = vld [vmem:[#allocation2 + $0x248] ss:$16 sps:$4 sm:$0xff]   ;;  %v2937_v28 = vld [vmem:[#allocation2 + $0x284] ss:$16 sps:$4 sm:$0xff]   ;;  %v2940_v29 = vld [vmem:[#allocation2 + $0x26c] ss:$16 sps:$4 sm:$0xff]  }
  0x44   :  { %1299 = vmatpush1.bf16.msra.mxu0 %v2862_v34  ;;  %v2935_v30 = vld [vmem:[#allocation2 + $0x280] ss:$16 sps:$4 sm:$0xff]   ;;  %v2938_v31 = vld [vmem:[#allocation2 + $0x268] ss:$16 sps:$4 sm:$0xff]   ;;  %v2943_v32 = vld [vmem:[#allocation2 + $0x2a4] ss:$16 sps:$4 sm:$0xff]  }
  0x45   :  { %1300 = vmatprep.subr.bf16.mxu0 %v2863_v36  ;;  %v2946_v33 = vld [vmem:[#allocation2 + $0x28c] ss:$16 sps:$4 sm:$0xff]   ;;  %v2941_v34 = vld [vmem:[#allocation2 + $0x2a0] ss:$16 sps:$4 sm:$0xff]   ;;  %v2949_v36 = vld [vmem:[#allocation2 + $0x2c4] ss:$16 sps:$4 sm:$0xff]  }
  0x46   :  { %1469 = vmatpush1.bf16.msra.mxu1 %v2859_v35  ;;  %v2944_v35 = vld [vmem:[#allocation2 + $0x288] ss:$16 sps:$4 sm:$0xff]   ;;  %v2967_v51 = vld [vmem:[#allocation2 + $0x324] ss:$16 sps:$4 sm:$0xff]   ;;  %v2970_v52 = vld [vmem:[#allocation2 + $0x30c] ss:$16 sps:$4 sm:$0xff]  }
  0x47   :  { %1470 = vmatprep.subr.bf16.mxu1 %v2867_v37  ;;  %v2952_v37 = vld [vmem:[#allocation2 + $0x2ac] ss:$16 sps:$4 sm:$0xff]   ;;  %v2968_v54 = vld [vmem:[#allocation2 + $0x308] ss:$16 sps:$4 sm:$0xff]   ;;  %v2997_v8 = vld [vmem:[#allocation2 + $0x3c4] ss:$16 sps:$4 sm:$0xff]  }
  0x48   :  { %1301 = vmatpush1.bf16.msra.mxu0 %v2868_v39  ;;  %v64_v39 = vld [vmem:[%s3526_s0 + $0x18] sm:$0xff] }
  0x49   :  { %1302 = vmatprep.subr.bf16.mxu0 %v2869_v40  ;;  %v71_v40 = vld [vmem:[%s3526_s0 + $0x50] sm:$0xff]  ;;  %v2992_v7 = vld [vmem:[#allocation2 + $0x388] ss:$16 sps:$4 sm:$0xff]  }
  0x4a   :  { %1471 = vmatpush1.bf16.msra.mxu1 %v2865_v38  ;;  %v2947_v38 = vld [vmem:[#allocation2 + $0x2c0] ss:$16 sps:$4 sm:$0xff]  }
  0x4b   :  { %1472 = vmatprep.subr.bf16.mxu1 %v2873_v41  ;;  %v2950_v41 = vld [vmem:[#allocation2 + $0x2a8] ss:$16 sps:$4 sm:$0xff]  }
  0x4c   :  { %1303 = vmatpush1.bf16.msra.mxu0 %v2874_v42  ;;  %v78_v42 = vpack.c.bf16 %v71_v40, %v64_v39  ;;  %v3033_v39 = vld [vmem:[#allocation2 + $0x484] ss:$16 sps:$4 sm:$0xff]   ;;  %v3036_v40 = vld [vmem:[#allocation2 + $0x46c] ss:$16 sps:$4 sm:$0xff]  }
  0x4d   :  { %1304 = vmatprep.subr.bf16.mxu0 %v2875_v44  ;;  %v2958_v44 = vld [vmem:[#allocation2 + $0x2cc] ss:$16 sps:$4 sm:$0xff]  }
  0x4e   :  { %1473 = vmatpush1.bf16.msra.mxu1 %v2871_v43  ;;  %v2955_v43 = vld [vmem:[#allocation2 + $0x2e4] ss:$16 sps:$4 sm:$0xff]  }
  0x4f   :  { %1474 = vmatprep.subr.bf16.mxu1 %v2879_v45  ;;  %v2953_v45 = vld [vmem:[#allocation2 + $0x2e0] ss:$16 sps:$4 sm:$0xff]  }
  0x50   :  { %1305 = vmatpush1.bf16.msra.mxu0 %v2880_v47  ;;  %v2961_v47 = vld [vmem:[#allocation2 + $0x304] ss:$16 sps:$4 sm:$0xff]  }
  0x51   :  { %1306 = vmatprep.subr.bf16.mxu0 %v2881_v48  ;;  %v2964_v48 = vld [vmem:[#allocation2 + $0x2ec] ss:$16 sps:$4 sm:$0xff]  }
  0x52   :  { %1475 = vmatpush1.bf16.msra.mxu1 %v2877_v46  ;;  %v2956_v46 = vld [vmem:[#allocation2 + $0x2c8] ss:$16 sps:$4 sm:$0xff]  }
  0x53   :  { %1476 = vmatprep.subr.bf16.mxu1 %v2885_v49  ;;  %v2959_v49 = vld [vmem:[#allocation2 + $0x300] ss:$16 sps:$4 sm:$0xff]  }
  0x54   :  { %1307 = vmatpush1.bf16.msra.mxu0 %v2886_v53  ;;  %v2965_v53 = vld [vmem:[#allocation2 + $0x320] ss:$16 sps:$4 sm:$0xff]  }
  0x55   :  { %1308 = vmatprep.subr.bf16.mxu0 %v2887_v55  ;;  %v2973_v55 = vld [vmem:[#allocation2 + $0x344] ss:$16 sps:$4 sm:$0xff]  }
  0x56   :  { %1477 = vmatpush1.bf16.msra.mxu1 %v2883_v50  ;;  %v2962_v50 = vld [vmem:[#allocation2 + $0x2e8] ss:$16 sps:$4 sm:$0xff]  }
  0x57   :  { %1478 = vmatprep.subr.bf16.mxu1 %v2891_v56  ;;  %v2976_v56 = vld [vmem:[#allocation2 + $0x32c] ss:$16 sps:$4 sm:$0xff]  }
  0x58   :  { %1309 = vmatpush1.bf16.msra.mxu0 %v2892_v57  ;;  %v2971_v57 = vld [vmem:[#allocation2 + $0x340] ss:$16 sps:$4 sm:$0xff]  }
  0x59   :  { %1310 = vmatprep.subr.bf16.mxu0 %v2893_v59  ;;  %v2979_v59 = vld [vmem:[#allocation2 + $0x364] ss:$16 sps:$4 sm:$0xff]  }
  0x5a   :  { %1479 = vmatpush1.bf16.msra.mxu1 %v2889_v58  ;;  %v2974_v58 = vld [vmem:[#allocation2 + $0x328] ss:$16 sps:$4 sm:$0xff]  }
  0x5b   :  { %1480 = vmatprep.subr.bf16.mxu1 %v2897_v60  ;;  %v2982_v60 = vld [vmem:[#allocation2 + $0x34c] ss:$16 sps:$4 sm:$0xff]  }
  0x5c   :  { %1311 = vmatpush1.bf16.msra.mxu0 %v2898_v61  ;;  %v2977_v61 = vld [vmem:[#allocation2 + $0x360] ss:$16 sps:$4 sm:$0xff]  }
  0x5d   :  { %1312 = vmatprep.subr.bf16.mxu0 %v2899_v63  ;;  %v2985_v63 = vld [vmem:[#allocation2 + $0x384] ss:$16 sps:$4 sm:$0xff]  }
  0x5e   :  { %1481 = vmatpush1.bf16.msra.mxu1 %v2895_v62  ;;  %v2980_v62 = vld [vmem:[#allocation2 + $0x348] ss:$16 sps:$4 sm:$0xff]  }
  0x5f   :  { %1482 = vmatprep.subr.bf16.mxu1 %v2903_v1  ;;  %v2988_v1 = vld [vmem:[#allocation2 + $0x36c] ss:$16 sps:$4 sm:$0xff]  }
  0x60   :  { %1313 = vmatpush1.bf16.msra.mxu0 %v2904_v2  ;;  %v2983_v2 = vld [vmem:[#allocation2 + $0x380] ss:$16 sps:$4 sm:$0xff]  }
  0x61   :  { %1314 = vmatprep.subr.bf16.mxu0 %v2905_v4  ;;  %v2991_v4 = vld [vmem:[#allocation2 + $0x3a4] ss:$16 sps:$4 sm:$0xff]  }
  0x62   :  { %1483 = vmatpush1.bf16.msra.mxu1 %v2901_v3  ;;  %v2986_v3 = vld [vmem:[#allocation2 + $0x368] ss:$16 sps:$4 sm:$0xff]  }
  0x63   :  { %1484 = vmatprep.subr.bf16.mxu1 %v2909_v5  ;;  %v2994_v5 = vld [vmem:[#allocation2 + $0x38c] ss:$16 sps:$4 sm:$0xff]  }
  0x64   :  { %1315 = vmatpush1.bf16.msra.mxu0 %v2910_v6  ;;  %v2989_v6 = vld [vmem:[#allocation2 + $0x3a0] ss:$16 sps:$4 sm:$0xff]  }
  0x65   :  { %1327 = vmatprep.subr.bf16.mxu0 %v2913_v10  ;;  %v2995_v10 = vld [vmem:[#allocation2 + $0x3c0] ss:$16 sps:$4 sm:$0xff]  }
  0x66   :  { %1485 = vmatpush1.bf16.msra.mxu1 %v2907_v9  ;;  %v3000_v9 = vld [vmem:[#allocation2 + $0x3ac] ss:$16 sps:$4 sm:$0xff]  }
  0x67   :  { %1486 = vmatprep.subr.bf16.mxu1 %v2916_v12  ;;  %1317 = vmatmul.mubr.bf16.vlgmr.msra.gmra.mrb[0].mxu0 %v75_v13  ;;  %v2998_v12 = vld [vmem:[#allocation2 + $0x3a8] ss:$16 sps:$4 sm:$0xff]  }
  0x68   :  { %1328 = vmatpush1.bf16.msra.mxu0 %v2911_v14  ;;  %1359 = vmatprep.mubr.bf16.mxu0 %v78_v42  ;;  %v3006_v14 = vld [vmem:[#allocation2 + $0x3cc] ss:$16 sps:$4 sm:$0xff]  }
  0x69   :  { %1329 = vmatprep.subr.bf16.mxu0 %v2919_v16  ;;  %v63_v16 = vld [vmem:[%s3526_s0 + $0x10] sm:$0xff] }
  0x6a   :  { %1487 = vmatpush1.bf16.msra.mxu1 %v2914_v15  ;;  %v3001_v15 = vld [vmem:[#allocation2 + $0x3e0] ss:$16 sps:$4 sm:$0xff]  }
  0x6b   :  { %1499 = vmatprep.subr.bf16.mxu1 %v2922_v17  ;;  %v70_v17 = vld [vmem:[%s3526_s0 + $0x48] sm:$0xff] }
  0x6c   :  { %1330 = vmatpush1.bf16.msra.mxu0 %v2917_v18  ;;  %v3004_v18 = vld [vmem:[#allocation2 + $0x3c8] ss:$16 sps:$4 sm:$0xff]  }
  0x6d   :  { %1489 = vmatmul.mubr.bf16.vlgmr.msra.gmra.mrb[4].mxu1 %v75_v13  ;;  %1331 = vmatprep.subr.bf16.mxu0 %v2925_v20  ;;  %v3003_v13 = vld [vmem:[#allocation2 + $0x3e4] ss:$16 sps:$4 sm:$0xff]   ;;  %v3012_v20 = vld [vmem:[#allocation2 + $0x3ec] ss:$16 sps:$4 sm:$0xff]  }
  0x6e   :  { %1500 = vmatpush1.bf16.msra.mxu1 %v2920_v19  ;;  %1531 = vmatprep.mubr.bf16.mxu1 %v78_v42  ;;  %v3009_v19 = vld [vmem:[#allocation2 + $0x404] ss:$16 sps:$4 sm:$0xff]   ;;  %v3034_v42 = vld [vmem:[#allocation2 + $0x468] ss:$16 sps:$4 sm:$0xff]  }
  0x6f   :  { %1501 = vmatprep.subr.bf16.mxu1 %v2928_v21  ;;  %v77_v21 = vpack.c.bf16 %v70_v17, %v63_v16  ;;  %v3088_v16 = vld [vmem:[#allocation2 + $0x588] ss:$16 sps:$4 sm:$0xff]   ;;  %v3093_v17 = vld [vmem:[#allocation2 + $0x5c4] ss:$16 sps:$4 sm:$0xff]  }
  0x70   :  { %1332 = vmatpush1.bf16.msra.mxu0 %v2923_v22  ;;  %v3007_v22 = vld [vmem:[#allocation2 + $0x400] ss:$16 sps:$4 sm:$0xff]  }
  0x71   :  { %1333 = vmatprep.subr.bf16.mxu0 %v2931_v24  ;;  %v3015_v24 = vld [vmem:[#allocation2 + $0x424] ss:$16 sps:$4 sm:$0xff]  }
  0x72   :  { %1502 = vmatpush1.bf16.msra.mxu1 %v2926_v23  ;;  %v3010_v23 = vld [vmem:[#allocation2 + $0x3e8] ss:$16 sps:$4 sm:$0xff]  }
  0x73   :  { %1503 = vmatprep.subr.bf16.mxu1 %v2934_v25  ;;  %v3018_v25 = vld [vmem:[#allocation2 + $0x40c] ss:$16 sps:$4 sm:$0xff]  }
  0x74   :  { %1334 = vmatpush1.bf16.msra.mxu0 %v2929_v26  ;;  %v66_v26 = vld [vmem:[%s3526_s0 + $0x28] sm:$0xff] }
  0x75   :  { %1335 = vmatprep.subr.bf16.mxu0 %v2937_v28  ;;  %v3013_v28 = vld [vmem:[#allocation2 + $0x420] ss:$16 sps:$4 sm:$0xff]  }
  0x76   :  { %1504 = vmatpush1.bf16.msra.mxu1 %v2932_v27  ;;  %v73_v27 = vld [vmem:[%s3526_s0 + $0x60] sm:$0xff] }
  0x77   :  { %1505 = vmatprep.subr.bf16.mxu1 %v2940_v29  ;;  %v80_v29 = vpack.c.bf16 %v73_v27, %v66_v26  ;;  %v3100_v26 = vld [vmem:[#allocation2 + $0x5c8] ss:$16 sps:$4 sm:$0xff]   ;;  %v3111_v27 = vld [vmem:[#allocation4 + $0x4] ss:$8 sps:$4 sm:$0xff]  }
  0x78   :  { %1336 = vmatpush1.bf16.msra.mxu0 %v2935_v30  ;;  %v3016_v30 = vld [vmem:[#allocation2 + $0x408] ss:$16 sps:$4 sm:$0xff]  }
  0x79   :  { %1337 = vmatprep.subr.bf16.mxu0 %v2943_v32  ;;  %v3024_v32 = vld [vmem:[#allocation2 + $0x42c] ss:$16 sps:$4 sm:$0xff]  }
  0x7a   :  { %1506 = vmatpush1.bf16.msra.mxu1 %v2938_v31  ;;  %v3021_v31 = vld [vmem:[#allocation2 + $0x444] ss:$16 sps:$4 sm:$0xff]  }
  0x7b   :  { %1507 = vmatprep.subr.bf16.mxu1 %v2946_v33  ;;  %v3019_v33 = vld [vmem:[#allocation2 + $0x440] ss:$16 sps:$4 sm:$0xff]  }
  0x7c   :  { %1338 = vmatpush1.bf16.msra.mxu0 %v2941_v34  ;;  %v3022_v34 = vld [vmem:[#allocation2 + $0x428] ss:$16 sps:$4 sm:$0xff]  }
  0x7d   :  { %1339 = vmatprep.subr.bf16.mxu0 %v2949_v36  ;;  %v3030_v36 = vld [vmem:[#allocation2 + $0x44c] ss:$16 sps:$4 sm:$0xff]  }
  0x7e   :  { %1508 = vmatpush1.bf16.msra.mxu1 %v2944_v35  ;;  %v3027_v35 = vld [vmem:[#allocation2 + $0x464] ss:$16 sps:$4 sm:$0xff]  }
  0x7f   :  { %1509 = vmatprep.subr.bf16.mxu1 %v2952_v37  ;;  %v3025_v37 = vld [vmem:[#allocation2 + $0x460] ss:$16 sps:$4 sm:$0xff]  }
  0x80   :  { %1340 = vmatpush1.bf16.msra.mxu0 %v2947_v38  ;;  %v3028_v38 = vld [vmem:[#allocation2 + $0x448] ss:$16 sps:$4 sm:$0xff]  }
  0x81   :  { %1341 = vmatprep.subr.bf16.mxu0 %v2955_v43  ;;  %v3039_v43 = vld [vmem:[#allocation2 + $0x4a4] ss:$16 sps:$4 sm:$0xff]  }
  0x82   :  { %1510 = vmatpush1.bf16.msra.mxu1 %v2950_v41  ;;  %v3031_v41 = vld [vmem:[#allocation2 + $0x480] ss:$16 sps:$4 sm:$0xff]  }
  0x83   :  { %1511 = vmatprep.subr.bf16.mxu1 %v2958_v44  ;;  %v3042_v44 = vld [vmem:[#allocation2 + $0x48c] ss:$16 sps:$4 sm:$0xff]  }
  0x84   :  { %1342 = vmatpush1.bf16.msra.mxu0 %v2953_v45  ;;  %v3037_v45 = vld [vmem:[#allocation2 + $0x4a0] ss:$16 sps:$4 sm:$0xff]  }
  0x85   :  { %1343 = vmatprep.subr.bf16.mxu0 %v2961_v47  ;;  %v3045_v47 = vld [vmem:[#allocation2 + $0x4c4] ss:$16 sps:$4 sm:$0xff]  }
  0x86   :  { %1512 = vmatpush1.bf16.msra.mxu1 %v2956_v46  ;;  %v3040_v46 = vld [vmem:[#allocation2 + $0x488] ss:$16 sps:$4 sm:$0xff]  }
  0x87   :  { %1513 = vmatprep.subr.bf16.mxu1 %v2964_v48  ;;  %v3048_v48 = vld [vmem:[#allocation2 + $0x4ac] ss:$16 sps:$4 sm:$0xff]  }
  0x88   :  { %1344 = vmatpush1.bf16.msra.mxu0 %v2959_v49  ;;  %v3043_v49 = vld [vmem:[#allocation2 + $0x4c0] ss:$16 sps:$4 sm:$0xff]  }
  0x89   :  { %1345 = vmatprep.subr.bf16.mxu0 %v2967_v51  ;;  %v3051_v51 = vld [vmem:[#allocation2 + $0x4e4] ss:$16 sps:$4 sm:$0xff]  }
  0x8a   :  { %1514 = vmatpush1.bf16.msra.mxu1 %v2962_v50  ;;  %v3046_v50 = vld [vmem:[#allocation2 + $0x4a8] ss:$16 sps:$4 sm:$0xff]  }
  0x8b   :  { %1515 = vmatprep.subr.bf16.mxu1 %v2970_v52  ;;  %v3054_v52 = vld [vmem:[#allocation2 + $0x4cc] ss:$16 sps:$4 sm:$0xff]  }
  0x8c   :  { %1346 = vmatpush1.bf16.msra.mxu0 %v2965_v53  ;;  %v3049_v53 = vld [vmem:[#allocation2 + $0x4e0] ss:$16 sps:$4 sm:$0xff]  }
  0x8d   :  { %1347 = vmatprep.subr.bf16.mxu0 %v2973_v55  ;;  %v3057_v55 = vld [vmem:[#allocation2 + $0x504] ss:$16 sps:$4 sm:$0xff]  }
  0x8e   :  { %1516 = vmatpush1.bf16.msra.mxu1 %v2968_v54  ;;  %v3052_v54 = vld [vmem:[#allocation2 + $0x4c8] ss:$16 sps:$4 sm:$0xff]  }
  0x8f   :  { %1517 = vmatprep.subr.bf16.mxu1 %v2976_v56  ;;  %v3060_v56 = vld [vmem:[#allocation2 + $0x4ec] ss:$16 sps:$4 sm:$0xff]  }
  0x90   :  { %1348 = vmatpush1.bf16.msra.mxu0 %v2971_v57  ;;  %v3055_v57 = vld [vmem:[#allocation2 + $0x500] ss:$16 sps:$4 sm:$0xff]  }
  0x91   :  { %1349 = vmatprep.subr.bf16.mxu0 %v2979_v59  ;;  %v3063_v59 = vld [vmem:[#allocation2 + $0x524] ss:$16 sps:$4 sm:$0xff]  }
  0x92   :  { %1518 = vmatpush1.bf16.msra.mxu1 %v2974_v58  ;;  %v3058_v58 = vld [vmem:[#allocation2 + $0x4e8] ss:$16 sps:$4 sm:$0xff]  }
  0x93   :  { %1519 = vmatprep.subr.bf16.mxu1 %v2982_v60  ;;  %v3066_v60 = vld [vmem:[#allocation2 + $0x50c] ss:$16 sps:$4 sm:$0xff]  }
  0x94   :  { %1350 = vmatpush1.bf16.msra.mxu0 %v2977_v61  ;;  %v3061_v61 = vld [vmem:[#allocation2 + $0x520] ss:$16 sps:$4 sm:$0xff]  }
  0x95   :  { %1351 = vmatprep.subr.bf16.mxu0 %v2985_v63  ;;  %v3069_v63 = vld [vmem:[#allocation2 + $0x544] ss:$16 sps:$4 sm:$0xff]  }
  0x96   :  { %1520 = vmatpush1.bf16.msra.mxu1 %v2980_v62  ;;  %v3064_v62 = vld [vmem:[#allocation2 + $0x508] ss:$16 sps:$4 sm:$0xff]  }
  0x97   :  { %1521 = vmatprep.subr.bf16.mxu1 %v2988_v1  ;;  %v3072_v1 = vld [vmem:[#allocation2 + $0x52c] ss:$16 sps:$4 sm:$0xff]  }
  0x98   :  { %1352 = vmatpush1.bf16.msra.mxu0 %v2983_v2  ;;  %v3067_v2 = vld [vmem:[#allocation2 + $0x540] ss:$16 sps:$4 sm:$0xff]  }
  0x99   :  { %1353 = vmatprep.subr.bf16.mxu0 %v2991_v4  ;;  %v3075_v4 = vld [vmem:[#allocation2 + $0x564] ss:$16 sps:$4 sm:$0xff]  }
  0x9a   :  { %1522 = vmatpush1.bf16.msra.mxu1 %v2986_v3  ;;  %v3070_v3 = vld [vmem:[#allocation2 + $0x528] ss:$16 sps:$4 sm:$0xff]  }
  0x9b   :  { %1523 = vmatprep.subr.bf16.mxu1 %v2994_v5  ;;  %v3078_v5 = vld [vmem:[#allocation2 + $0x54c] ss:$16 sps:$4 sm:$0xff]  }
  0x9c   :  { %1354 = vmatpush1.bf16.msra.mxu0 %v2989_v6  ;;  %v3073_v6 = vld [vmem:[#allocation2 + $0x560] ss:$16 sps:$4 sm:$0xff]  }
  0x9d   :  { %1355 = vmatprep.subr.bf16.mxu0 %v2997_v8  ;;  %v3081_v8 = vld [vmem:[#allocation2 + $0x584] ss:$16 sps:$4 sm:$0xff]  }
  0x9e   :  { %1524 = vmatpush1.bf16.msra.mxu1 %v2992_v7  ;;  %v3076_v7 = vld [vmem:[#allocation2 + $0x548] ss:$16 sps:$4 sm:$0xff]  }
  0x9f   :  { %1525 = vmatprep.subr.bf16.mxu1 %v3000_v9  ;;  %v3084_v9 = vld [vmem:[#allocation2 + $0x56c] ss:$16 sps:$4 sm:$0xff]  }
  0xa0   :  { %1356 = vmatpush1.bf16.msra.mxu0 %v2995_v10  ;;  %v3079_v10 = vld [vmem:[#allocation2 + $0x580] ss:$16 sps:$4 sm:$0xff]  }
  0xa1   :  { %1357 = vmatprep.subr.bf16.mxu0 %v3003_v13  ;;  %v3087_v13 = vld [vmem:[#allocation2 + $0x5a4] ss:$16 sps:$4 sm:$0xff]  }
  0xa2   :  { %1526 = vmatpush1.bf16.msra.mxu1 %v2998_v12  ;;  %v3082_v12 = vld [vmem:[#allocation2 + $0x568] ss:$16 sps:$4 sm:$0xff]  }
  0xa3   :  { %1527 = vmatprep.subr.bf16.mxu1 %v3006_v14  ;;  %v3090_v14 = vld [vmem:[#allocation2 + $0x58c] ss:$16 sps:$4 sm:$0xff]  }
  0xa4   :  { %1358 = vmatpush1.bf16.msra.mxu0 %v3001_v15  ;;  %v3085_v15 = vld [vmem:[#allocation2 + $0x5a0] ss:$16 sps:$4 sm:$0xff]  }
  0xa5   :  { %1370 = vmatprep.subr.bf16.mxu0 %v3009_v19  ;;  %v3091_v19 = vld [vmem:[#allocation2 + $0x5c0] ss:$16 sps:$4 sm:$0xff]  }
  0xa6   :  { %1528 = vmatpush1.bf16.msra.mxu1 %v3004_v18  ;;  %v3096_v18 = vld [vmem:[#allocation2 + $0x5ac] ss:$16 sps:$4 sm:$0xff]  }
  0xa7   :  { %1529 = vmatprep.subr.bf16.mxu1 %v3012_v20  ;;  %1360 = vmatmul.mubr.bf16.vlgmr.msra.gmra.mrb[0].mxu0 %v77_v21  ;;  %v3094_v20 = vld [vmem:[#allocation2 + $0x5a8] ss:$16 sps:$4 sm:$0xff]  }
  0xa8   :  { %1371 = vmatpush1.bf16.msra.mxu0 %v3007_v22  ;;  %1402 = vmatprep.mubr.bf16.mxu0 %v80_v29  ;;  %v3102_v22 = vld [vmem:[#allocation2 + $0x5cc] ss:$16 sps:$4 sm:$0xff]  }
  0xa9   :  { %1372 = vmatprep.subr.bf16.mxu0 %v3015_v24  ;;  %v65_v24 = vld [vmem:[%s3526_s0 + $0x20] sm:$0xff] }
  0xaa   :  { %1530 = vmatpush1.bf16.msra.mxu1 %v3010_v23  ;;  %v3097_v23 = vld [vmem:[#allocation2 + $0x5e0] ss:$16 sps:$4 sm:$0xff]  }
  0xab   :  { %1542 = vmatprep.subr.bf16.mxu1 %v3018_v25  ;;  %v72_v25 = vld [vmem:[%s3526_s0 + $0x58] sm:$0xff] }
  0xac   :  { %1373 = vmatpush1.bf16.msra.mxu0 %v3013_v28  ;;  %v3105_v28 = vld [vmem:[#allocation2 + $0x5ec] ss:$16 sps:$4 sm:$0xff]  }
  0xad   :  { %1532 = vmatmul.mubr.bf16.vlgmr.msra.gmra.mrb[4].mxu1 %v77_v21  ;;  %1374 = vmatprep.subr.bf16.mxu0 %v3021_v31  ;;  %v3099_v21 = vld [vmem:[#allocation2 + $0x5e4] ss:$16 sps:$4 sm:$0xff]   ;;  %v3103_v31 = vld [vmem:[#allocation2 + $0x5e8] ss:$16 sps:$4 sm:$0xff]  }
  0xae   :  { %1543 = vmatpush1.bf16.msra.mxu1 %v3016_v30  ;;  %1574 = vmatprep.mubr.bf16.mxu1 %v80_v29  ;;  %v79_v29 = vpack.c.bf16 %v72_v25, %v65_v24  ;;  %v3109_v30 = vld [vmem:[#allocation4] ss:$8 sps:$4 sm:$0xff]  }
  0xaf   :  { %1544 = vmatprep.subr.bf16.mxu1 %v3024_v32  ;;  %v3114_v32 = vld [vmem:[#allocation4 + $0x14] ss:$8 sps:$4 sm:$0xff]  }
  0xb0   :  { %1375 = vmatpush1.bf16.msra.mxu0 %v3019_v33  ;;  %v3108_v33 = vld [vmem:[#allocation2 + $0x60c] ss:$16 sps:$4 sm:$0xff]  }
  0xb1   :  { %1376 = vmatprep.subr.bf16.mxu0 %v3027_v35  ;;  %v3106_v35 = vld [vmem:[#allocation2 + $0x608] ss:$16 sps:$4 sm:$0xff]  }
  0xb2   :  { %1545 = vmatpush1.bf16.msra.mxu1 %v3022_v34  ;;  %v3112_v34 = vld [vmem:[#allocation4 + $0x10] ss:$8 sps:$4 sm:$0xff]  }
  0xb3   :  { %1546 = vmatprep.subr.bf16.mxu1 %v3030_v36  ;;  %v3117_v36 = vld [vmem:[#allocation4 + $0x24] ss:$8 sps:$4 sm:$0xff]  }
  0xb4   :  { %1377 = vmatpush1.bf16.msra.mxu0 %v3025_v37  ;;  %v3115_v37 = vld [vmem:[#allocation4 + $0x20] ss:$8 sps:$4 sm:$0xff]  }
  0xb5   :  { %1378 = vmatprep.subr.bf16.mxu0 %v3033_v39  ;;  %v3118_v39 = vld [vmem:[#allocation4 + $0x30] ss:$8 sps:$4 sm:$0xff]  }
  0xb6   :  { %1547 = vmatpush1.bf16.msra.mxu1 %v3028_v38  ;;  %v3120_v38 = vld [vmem:[#allocation4 + $0x34] ss:$8 sps:$4 sm:$0xff]  }
  0xb7   :  { %1548 = vmatprep.subr.bf16.mxu1 %v3036_v40  ;;  %v3123_v40 = vld [vmem:[#allocation4 + $0x44] ss:$8 sps:$4 sm:$0xff]  }
  0xb8   :  { %1379 = vmatpush1.bf16.msra.mxu0 %v3031_v41  ;;  %v3121_v41 = vld [vmem:[#allocation4 + $0x40] ss:$8 sps:$4 sm:$0xff]  }
  0xb9   :  { %1380 = vmatprep.subr.bf16.mxu0 %v3039_v43  ;;  %v3124_v43 = vld [vmem:[#allocation4 + $0x50] ss:$8 sps:$4 sm:$0xff]  }
  0xba   :  { %1549 = vmatpush1.bf16.msra.mxu1 %v3034_v42  ;;  %v3126_v42 = vld [vmem:[#allocation4 + $0x54] ss:$8 sps:$4 sm:$0xff]  }
  0xbb   :  { %1550 = vmatprep.subr.bf16.mxu1 %v3042_v44  ;;  %v3129_v44 = vld [vmem:[#allocation4 + $0x64] ss:$8 sps:$4 sm:$0xff]  }
  0xbc   :  { %1381 = vmatpush1.bf16.msra.mxu0 %v3037_v45  ;;  %v3127_v45 = vld [vmem:[#allocation4 + $0x60] ss:$8 sps:$4 sm:$0xff]  }
  0xbd   :  { %1382 = vmatprep.subr.bf16.mxu0 %v3045_v47 }
  0xbe   :  { %1551 = vmatpush1.bf16.msra.mxu1 %v3040_v46 }
  0xbf   :  { %1552 = vmatprep.subr.bf16.mxu1 %v3048_v48  ;;  %v3130_v48 = vld [vmem:[#allocation4 + $0x70] ss:$8 sps:$4 sm:$0xff]  }
  0xc0   :  { %1383 = vmatpush1.bf16.msra.mxu0 %v3043_v49 }
  0xc1   :  { %1384 = vmatprep.subr.bf16.mxu0 %v3051_v51 }
  0xc2   :  { %1553 = vmatpush1.bf16.msra.mxu1 %v3046_v50  ;;  %v3135_v50 = vld [vmem:[#allocation4 + $0x84] ss:$8 sps:$4 sm:$0xff]  }
  0xc3   :  { %1554 = vmatprep.subr.bf16.mxu1 %v3054_v52  ;;  %v3138_v52 = vld [vmem:[#allocation4 + $0x94] ss:$8 sps:$4 sm:$0xff]  }
  0xc4   :  { %1385 = vmatpush1.bf16.msra.mxu0 %v3049_v53  ;;  %v3136_v53 = vld [vmem:[#allocation4 + $0x90] ss:$8 sps:$4 sm:$0xff]  }
  0xc5   :  { %1386 = vmatprep.subr.bf16.mxu0 %v3057_v55  ;;  %v3139_v55 = vld [vmem:[#allocation4 + $0xa0] ss:$8 sps:$4 sm:$0xff]  }
  0xc6   :  { %1555 = vmatpush1.bf16.msra.mxu1 %v3052_v54  ;;  %v3141_v54 = vld [vmem:[#allocation4 + $0xa4] ss:$8 sps:$4 sm:$0xff]  }
  0xc7   :  { %1556 = vmatprep.subr.bf16.mxu1 %v3060_v56  ;;  %v3144_v56 = vld [vmem:[#allocation4 + $0xb4] ss:$8 sps:$4 sm:$0xff]  }
  0xc8   :  { %1387 = vmatpush1.bf16.msra.mxu0 %v3055_v57  ;;  %v3142_v57 = vld [vmem:[#allocation4 + $0xb0] ss:$8 sps:$4 sm:$0xff]  }
  0xc9   :  { %1388 = vmatprep.subr.bf16.mxu0 %v3063_v59  ;;  %v3145_v59 = vld [vmem:[#allocation4 + $0xc0] ss:$8 sps:$4 sm:$0xff]  }
  0xca   :  { %1557 = vmatpush1.bf16.msra.mxu1 %v3058_v58  ;;  %v3147_v58 = vld [vmem:[#allocation4 + $0xc4] ss:$8 sps:$4 sm:$0xff]  }
  0xcb   :  { %1558 = vmatprep.subr.bf16.mxu1 %v3066_v60  ;;  %v3150_v60 = vld [vmem:[#allocation4 + $0xd4] ss:$8 sps:$4 sm:$0xff]  }
  0xcc   :  { %1389 = vmatpush1.bf16.msra.mxu0 %v3061_v61  ;;  %v3148_v61 = vld [vmem:[#allocation4 + $0xd0] ss:$8 sps:$4 sm:$0xff]  }
  0xcd   :  { %1390 = vmatprep.subr.bf16.mxu0 %v3069_v63  ;;  %v3151_v63 = vld [vmem:[#allocation4 + $0xe0] ss:$8 sps:$4 sm:$0xff]  }
  0xce   :  { %1559 = vmatpush1.bf16.msra.mxu1 %v3064_v62  ;;  %v3153_v62 = vld [vmem:[#allocation4 + $0xe4] ss:$8 sps:$4 sm:$0xff]  }
  0xcf   :  { %1560 = vmatprep.subr.bf16.mxu1 %v3072_v1  ;;  %v3156_v1 = vld [vmem:[#allocation4 + $0xf4] ss:$8 sps:$4 sm:$0xff]  }
  0xd0   :  { %1391 = vmatpush1.bf16.msra.mxu0 %v3067_v2  ;;  %v3154_v2 = vld [vmem:[#allocation4 + $0xf0] ss:$8 sps:$4 sm:$0xff]  }
  0xd1   :  { %1392 = vmatprep.subr.bf16.mxu0 %v3075_v4  ;;  %v3205_v4 = vld [vmem:[%s3531_s5 + $0x40] sm:$0xff]  }
  0xd2   :  { %1561 = vmatpush1.bf16.msra.mxu1 %v3070_v3  ;;  %v3159_v3 = vld [vmem:[#allocation4 + $0x104] ss:$8 sps:$4 sm:$0xff]  }
  0xd3   :  { %1562 = vmatprep.subr.bf16.mxu1 %v3078_v5  ;;  %v3206_v5 = vld [vmem:[%s3531_s5] sm:$0xff]  }
  0xd4   :  { %1393 = vmatpush1.bf16.msra.mxu0 %v3073_v6  ;;  %v3207_v6 = vld [vmem:[%s3531_s5 + $0x48] sm:$0xff]  }
  0xd5   :  { %1394 = vmatprep.subr.bf16.mxu0 %v3081_v8  ;;  %v3209_v8 = vld [vmem:[%s3531_s5 + $0x50] sm:$0xff]  }
  0xd6   :  { %1563 = vmatpush1.bf16.msra.mxu1 %v3076_v7  ;;  %v3208_v7 = vld [vmem:[%s3531_s5 + $0x8] sm:$0xff]  }
  0xd7   :  { %1564 = vmatprep.subr.bf16.mxu1 %v3084_v9  ;;  %v3210_v9 = vld [vmem:[%s3531_s5 + $0x10] sm:$0xff]  }
  0xd8   :  { %1395 = vmatpush1.bf16.msra.mxu0 %v3079_v10  ;;  %v3211_v10 = vld [vmem:[%s3531_s5 + $0x58] sm:$0xff]  }
  0xd9   :  { %1396 = vmatprep.subr.bf16.mxu0 %v3087_v13  ;;  %v3213_v13 = vld [vmem:[%s3531_s5 + $0x60] sm:$0xff]  }
  0xda   :  { %1565 = vmatpush1.bf16.msra.mxu1 %v3082_v12  ;;  %v3212_v12 = vld [vmem:[%s3531_s5 + $0x18] sm:$0xff]  }
  0xdb   :  { %1566 = vmatprep.subr.bf16.mxu1 %v3090_v14  ;;  %v3214_v14 = vld [vmem:[%s3531_s5 + $0x20] sm:$0xff]  }
  0xdc   :  { %1397 = vmatpush1.bf16.msra.mxu0 %v3085_v15  ;;  %v3215_v15 = vld [vmem:[%s3531_s5 + $0x68] sm:$0xff]  }
  0xdd   :  { %1398 = vmatprep.subr.bf16.mxu0 %v3093_v17 }
  0xde   :  { %1567 = vmatpush1.bf16.msra.mxu1 %v3088_v16  ;;  %v280_v16 = vlaneseq }
  0xdf   :  { %1568 = vmatprep.subr.bf16.mxu1 %v3096_v18 }
  0xe0   :  { %1399 = vmatpush1.bf16.msra.mxu0 %v3091_v19  ;;  %v3451_v17 = vshrl.u32 %v280_v16, 7  ;;  %v278_v19 = vld [vmem:[%s3528_s2] sm:$0xf]  ;;  %v3192_v16 = vld [vmem:[#allocation4 + $0x1b4] ss:$8 sps:$4 sm:$0xff]  }
  0xe1   :  { %1400 = vmatprep.subr.bf16.mxu0 %v3099_v21 }
  0xe2   :  { %1569 = vmatpush1.bf16.msra.mxu1 %v3094_v20  ;;  %v282_v18 = vsub.s32 0, %v3451_v17  ;;  %v286_v20 = vsub.s32 1, %v3451_v17 }
  0xe3   :  { %1570 = vmatprep.subr.bf16.mxu1 %v3102_v22 }
  0xe4   :  { %1401 = vmatpush1.bf16.msra.mxu0 %v3097_v23  ;;  %v283_v21 = vrot.slane %v278_v19, %v282_v18  ;;  %v287_v22 = vrot.slane %v278_v19, %v286_v20 }
  0xe5   :  { %2036 = vmatprep.subr.bf16.mxu0 %v3111_v27 }
  0xe6   :  { %1571 = vmatpush1.bf16.msra.mxu1 %v3100_v26 }
  0xe7   :  { %1572 = vmatprep.subr.bf16.mxu1 %v3105_v28  ;;  %1403 = vmatmul.mubr.bf16.vlgmr.msra.gmra.mrb[0].mxu0 %v79_v29 }
  0xe8   :  { %2037 = vmatpush1.bf16.msra.mxu0 %v3109_v30 }
  0xe9   :  { %2038 = vmatprep.subr.bf16.mxu0 %v3114_v32 }
  0xea   :  { %1573 = vmatpush1.bf16.msra.mxu1 %v3103_v31 }
  0xeb   :  { %1585 = vmatprep.subr.bf16.mxu1 %v3108_v33 }
  0xec   :  { %2039 = vmatpush1.bf16.msra.mxu0 %v3112_v34 }
  0xed   :  { %1575 = vmatmul.mubr.bf16.vlgmr.msra.gmra.mrb[4].mxu1 %v79_v29  ;;  %2040 = vmatprep.subr.bf16.mxu0 %v3117_v36 }
  0xee   :  { %1586 = vmatpush1.bf16.msra.mxu1 %v3106_v35  ;;  %1617 = vmatprep.mubr.bf16.mxu1 %v3283_v0  ;;  %v3132_v0 = vld [vmem:[#allocation4 + $0x74] ss:$8 sps:$4 sm:$0xff]  }
  0xef   :  { %2715 = vmatprep.subr.bf16.mxu1 %v3205_v4  ;;  %v3172_v4 = vld [vmem:[#allocation4 + $0x150] ss:$8 sps:$4 sm:$0xff]  }
  0xf0   :  { %2041 = vmatpush1.bf16.msra.mxu0 %v3115_v37 }
  0xf1   :  { %2042 = vmatprep.subr.bf16.mxu0 %v3120_v38 }
  0xf4   :  { %2043 = vmatpush1.bf16.msra.mxu0 %v3118_v39 }
  0xf5   :  { %2044 = vmatprep.subr.bf16.mxu0 %v3123_v40 }
  0xf8   :  { %2045 = vmatpush1.bf16.msra.mxu0 %v3121_v41  ;;  %v3157_v41 = vld [vmem:[#allocation4 + $0x100] ss:$8 sps:$4 sm:$0xff]  }
  0xf9   :  { %2624 = vmatmul.mubr.msk.bf16.vlgmr.msra.gmra.mrb[4].mxu1 %vm1280_vm0, %v3367_v11  ;;  %2046 = vmatprep.subr.bf16.mxu0 %v3126_v42  ;;  %v3133_v11 = vld [vmem:[#allocation4 + $0x80] ss:$8 sps:$4 sm:$0xff]   ;;  %v290_v42 = vsub.s32 2, %v3451_v17 }
  0xfa   :  { %2716 = vmatpush3.bf16.msra.mxu1 %v3206_v5  ;;  %v3177_v5 = vld [vmem:[#allocation4 + $0x164] ss:$8 sps:$4 sm:$0xff]  }
  0xfb   :  { %2717 = vmatprep.subr.bf16.mxu1 %v3207_v6  ;;  %v3175_v6 = vld [vmem:[#allocation4 + $0x160] ss:$8 sps:$4 sm:$0xff]  }
  0xfc   :  { %2047 = vmatpush1.bf16.msra.mxu0 %v3124_v43  ;;  %v3162_v43 = vld [vmem:[#allocation4 + $0x114] ss:$8 sps:$4 sm:$0xff]  }
  0xfd   :  { %2048 = vmatprep.subr.bf16.mxu0 %v3129_v44  ;;  %v294_v44 = vsub.s32 3, %v3451_v17  ;;  %v3222_v17 = vld [vmem:[%s3533_s7 + $0x8] sm:$0xff]  }
  0xfe   :  { %2718 = vmatpush3.bf16.msra.mxu1 %v3208_v7  ;;  %v3180_v7 = vld [vmem:[#allocation4 + $0x174] ss:$8 sps:$4 sm:$0xff]  }
  0xff   :  { %2719 = vmatprep.subr.bf16.mxu1 %v3209_v8  ;;  %v3178_v8 = vld [vmem:[#allocation4 + $0x170] ss:$8 sps:$4 sm:$0xff]  }
 0x100   :  { %v3410_v46 = vpop.f32.mrb[0].mxu1  ;;  %2049 = vmatpush1.bf16.msra.mxu0 %v3127_v45  ;;  %v291_v45 = vrot.slane %v278_v19, %v290_v42 }
 0x101   :  { %v3412_v47 = vpop.f32.mrb[1].mxu1  ;;  %2050 = vmatprep.subr.bf16.mxu0 %v3132_v0  ;;  %v3160_v0 = vld [vmem:[#allocation4 + $0x110] ss:$8 sps:$4 sm:$0xff]  }
 0x102   :  { %v3414_v49 = vpop.f32.mrb[2].mxu1  ;;  %2720 = vmatpush3.bf16.msra.mxu1 %v3210_v9  ;;  %v3183_v9 = vld [vmem:[#allocation4 + $0x184] ss:$8 sps:$4 sm:$0xff]  }
 0x103   :  { %v3416_v51 = vpop.f32.mrb[3].mxu1  ;;  %2721 = vmatprep.subr.bf16.mxu1 %v3211_v10  ;;  %v3181_v10 = vld [vmem:[#allocation4 + $0x180] ss:$8 sps:$4 sm:$0xff]  }
 0x104   :  { %2051 = vmatpush1.bf16.msra.mxu0 %v3130_v48 }
 0x105   :  { %2052 = vmatprep.subr.bf16.mxu0 %v3135_v50 }
 0x106   :  { %2722 = vmatpush3.bf16.msra.mxu1 %v3212_v12  ;;  %v3186_v12 = vld [vmem:[#allocation4 + $0x194] ss:$8 sps:$4 sm:$0xff]  }
 0x107   :  { %2723 = vmatprep.subr.bf16.mxu1 %v3213_v13  ;;  %v3184_v13 = vld [vmem:[#allocation4 + $0x190] ss:$8 sps:$4 sm:$0xff]  }
 0x108   :  { %2053 = vmatpush1.bf16.msra.mxu0 %v3133_v11 }
 0x109   :  { %2054 = vmatprep.subr.bf16.mxu0 %v3138_v52 }
 0x10a   :  { %2724 = vmatpush3.bf16.msra.mxu1 %v3214_v14  ;;  %v3189_v14 = vld [vmem:[#allocation4 + $0x1a4] ss:$8 sps:$4 sm:$0xff]  }
 0x10b   :  { %2725 = vmatprep.subr.bf16.mxu1 %v3215_v15  ;;  %v3187_v15 = vld [vmem:[#allocation4 + $0x1a0] ss:$8 sps:$4 sm:$0xff]  }
 0x10c   :  { %2055 = vmatpush1.bf16.msra.mxu0 %v3136_v53  ;;  %v3168_v53 = vld [vmem:[#allocation4 + $0x134] ss:$8 sps:$4 sm:$0xff]  }
 0x10d   :  { %2056 = vmatprep.subr.bf16.mxu0 %v3141_v54 }
 0x110   :  { %2057 = vmatpush1.bf16.msra.mxu0 %v3139_v55 }
 0x111   :  { %2058 = vmatprep.subr.bf16.mxu0 %v3144_v56 }
 0x114   :  { %2059 = vmatpush1.bf16.msra.mxu0 %v3142_v57 }
 0x115   :  { %2060 = vmatprep.subr.bf16.mxu0 %v3147_v58 }
 0x118   :  { %2061 = vmatpush1.bf16.msra.mxu0 %v3145_v59  ;;  %v3166_v59 = vld [vmem:[#allocation4 + $0x130] ss:$8 sps:$4 sm:$0xff]  }
 0x119   :  { %2062 = vmatprep.subr.bf16.mxu0 %v3150_v60 }
 0x11c   :  { %2063 = vmatpush1.bf16.msra.mxu0 %v3148_v61 }
 0x11d   :  { %2064 = vmatprep.subr.bf16.mxu0 %v3153_v62  ;;  %v3171_v62 = vld [vmem:[#allocation4 + $0x144] ss:$8 sps:$4 sm:$0xff]  }
 0x120   :  { %2065 = vmatpush1.bf16.msra.mxu0 %v3151_v63 }
 0x121   :  { %2066 = vmatprep.subr.bf16.mxu0 %v3156_v1 }
 0x124   :  { %2067 = vmatpush1.bf16.msra.mxu0 %v3154_v2  ;;  %v3169_v2 = vld [vmem:[#allocation4 + $0x140] ss:$8 sps:$4 sm:$0xff]  }
 0x125   :  { %2079 = vmatprep.subr.bf16.mxu0 %v3159_v3  ;;  %v3174_v3 = vld [vmem:[#allocation4 + $0x154] ss:$8 sps:$4 sm:$0xff]  }
 0x1ba   :  { %v1404_v23 = vpop.f32.mrb[0].mxu0 }
 0x1bb   :  { %v2766_v24 = vadd.f32 %v1404_v23, %v283_v21  ;;  %v1406_v25 = vpop.f32.mrb[1].mxu0  ;;  %v3198_v23 = vld [vmem:[#allocation4 + $0x1d4] ss:$8 sps:$4 sm:$0xff]  }
 0x1bc   :  { %v2768_v26 = vadd.f32 %v1406_v25, %v287_v22  ;;  %v1408_v27 = vpop.f32.mrb[2].mxu0  ;;  %v3201_v25 = vld [vmem:[#allocation4 + $0x1e4] ss:$8 sps:$4 sm:$0xff]  }
 0x1bd   :  { %v2767_v28 = vadd.f32 %v2766_v24, %v3410_v46  ;;  %v2770_v29 = vadd.f32 %v1408_v27, %v283_v21  ;;  %v1410_v30 = vpop.f32.mrb[3].mxu0  ;;  %v295_v46 = vrot.slane %v278_v19, %v294_v44  ;;  %v3190_v19 = vld [vmem:[#allocation4 + $0x1b0] ss:$8 sps:$4 sm:$0xff]   ;;  %v3195_v21 = vld [vmem:[#allocation4 + $0x1c4] ss:$8 sps:$4 sm:$0xff]  }
 0x1be   :  { %v2769_v31 = vadd.f32 %v2768_v26, %v3412_v47  ;;  %v2772_v32 = vadd.f32 %v1410_v30, %v287_v22  ;;  %v3165_v47 = vld [vmem:[#allocation4 + $0x124] ss:$8 sps:$4 sm:$0xff]   ;;  %v3193_v22 = vld [vmem:[#allocation4 + $0x1c0] ss:$8 sps:$4 sm:$0xff]   ;;  %v3196_v24 = vld [vmem:[#allocation4 + $0x1d0] ss:$8 sps:$4 sm:$0xff]  }
 0x1bf   :  { %v2771_v33 = vadd.f32 %v2770_v29, %v3414_v49  ;;  %v1628_v35 = vmax.f32 %v2767_v28, 0.0  ;;  %v3199_v26 = vld [vmem:[#allocation4 + $0x1e0] ss:$8 sps:$4 sm:$0xff]   ;;  %v3204_v27 = vld [vmem:[#allocation4 + $0x1f4] ss:$8 sps:$4 sm:$0xff]  }
 0x1c0   :  { %v2773_v34 = vadd.f32 %v2772_v32, %v3416_v51  ;;  %v1629_v37 = vmax.f32 %v2769_v31, 0.0  ;;  %v3163_v51 = vld [vmem:[#allocation4 + $0x120] ss:$8 sps:$4 sm:$0xff]   ;;  %v3202_v28 = vld [vmem:[#allocation4 + $0x1f0] ss:$8 sps:$4 sm:$0xff]  }
 0x1c1   :  { %v1632_v36 = vmax.f32 %v2771_v33, 0.0  ;;  %v3216_v29 = vld [vmem:[%s3531_s5 + $0x28] sm:$0xff]   ;;  %v3217_v30 = vld [vmem:[%s3531_s5 + $0x70] sm:$0xff]   ;;  %v3219_v32 = vld [vmem:[%s3531_s5 + $0x78] sm:$0xff]  }
 0x1c2   :  { %v1633_v38 = vmax.f32 %v2773_v34, 0.0  ;;  %2726 = vmatpush3.bf16.msra.mxu1 %v3216_v29  ;;  %v3218_v31 = vld [vmem:[%s3531_s5 + $0x30] sm:$0xff]   ;;  %v3220_v33 = vld [vmem:[%s3531_s5 + $0x38] sm:$0xff]   ;;  %v3284_v34 = vmov 0.0  }
 0x1c3   :  { %v1636_v39 = vpack.c.bf16 %v1632_v36, %v1628_v35  ;;  %2727 = vmatprep.subr.bf16.mxu1 %v3217_v30  ;;  %v1704_v35 = vld [vmem:[%s3530_s4] sm:$0x3] }
 0x1c4   :  { %v1637_v40 = vpack.c.bf16 %v1633_v38, %v1629_v37  ;;  %v1709_v36 = vrot.slane %v1704_v35, %v282_v18  ;;  %v1713_v37 = vrot.slane %v1704_v35, %v286_v20  ;;  %v3221_v18 = vld [vmem:[%s3533_s7] sm:$0xff]   ;;  %v3223_v20 = vld [vmem:[%s3533_s7 + $0x10] sm:$0xff]  }
 0x1c6   :  { %2068 = vmatprep.mubr.bf16.mxu0 %v1637_v40  ;;  %2728 = vmatpush3.bf16.msra.mxu1 %v3218_v31 }
 0x1c7   :  { %2069 = vmatmul.mubr.bf16.vlgmr.msra.gmra.mrb[4].mxu0 %v1636_v39  ;;  %2729 = vmatprep.subr.bf16.mxu1 %v3219_v32 }
 0x1c8   :  { %2080 = vmatpush1.bf16.msra.mxu0 %v3157_v41 }
 0x1c9   :  { %2081 = vmatprep.subr.bf16.mxu0 %v3162_v43 }
 0x1ca   :  { %2730 = vmatpush3.bf16.msra.mxu1 %v3220_v33 }
 0x1cb   :  { %2746 = vmatprep.subr.bf16.mxu1 %v3284_v34 }
 0x1cc   :  { %v1619_v48 = vpop.f32.mrb[4].mxu1  ;;  %2082 = vmatpush1.bf16.msra.mxu0 %v3160_v0 }
 0x1cd   :  { %v2774_v49 = vadd.f32 %v1619_v48, %v291_v45  ;;  %v1621_v50 = vpop.f32.mrb[5].mxu1  ;;  %2083 = vmatprep.subr.bf16.mxu0 %v3165_v47 }
 0x1ce   :  { %v2775_v11 = vadd.f32 %v1621_v50, %v295_v46  ;;  %v1623_v52 = vpop.f32.mrb[6].mxu1 }
 0x1cf   :  { %v2776_v54 = vadd.f32 %v1623_v52, %v291_v45  ;;  %v1625_v55 = vpop.f32.mrb[7].mxu1  ;;  %v1630_v57 = vmax.f32 %v2774_v49, 0.0  ;;  %v3226_v52 = vld [vmem:[%s3533_s7 + $0x28] sm:$0xff]  }
 0x1d0   :  { %v2777_v56 = vadd.f32 %v1625_v55, %v295_v46  ;;  %2084 = vmatpush1.bf16.msra.mxu0 %v3163_v51  ;;  %v1631_v60 = vmax.f32 %v2775_v11, 0.0  ;;  %v3224_v51 = vld [vmem:[%s3533_s7 + $0x18] sm:$0xff]   ;;  %v3225_v11 = vld [vmem:[%s3533_s7 + $0x20] sm:$0xff]  }
 0x1d1   :  { %v1634_v58 = vmax.f32 %v2776_v54, 0.0  ;;  %2085 = vmatprep.subr.bf16.mxu0 %v3168_v53  ;;  %v3227_v53 = vld [vmem:[%s3533_s7 + $0x30] sm:$0xff]   ;;  %v3228_v54 = vld [vmem:[%s3533_s7 + $0x38] sm:$0xff]  }
 0x1d2   :  { %v1635_v61 = vmax.f32 %v2777_v56, 0.0  ;;  %v2689_v56 = vld [vmem:[%s3532_s6] ss:$0 sm:$0xff] }
 0x1d3   :  { %v1638_v63 = vpack.c.bf16 %v1634_v58, %v1630_v57 }
 0x1d4   :  { %v1639_v1 = vpack.c.bf16 %v1635_v61, %v1631_v60  ;;  %2086 = vmatpush1.bf16.msra.mxu0 %v3166_v59 }
 0x1d5   :  { %2087 = vmatprep.subr.bf16.mxu0 %v3171_v62 }
 0x1d6   :  { %2111 = vmatprep.mubr.bf16.mxu0 %v1639_v1 }
 0x1d8   :  { %2088 = vmatpush1.bf16.msra.mxu0 %v3169_v2 }
 0x1d9   :  { %2089 = vmatprep.subr.bf16.mxu0 %v3174_v3 }
 0x1dc   :  { %2090 = vmatpush1.bf16.msra.mxu0 %v3172_v4  ;;  %v2706_v4 = vld [vmem:[%s3534_s8] ss:$0 sm:$0xff] }
 0x1dd   :  { %2091 = vmatprep.subr.bf16.mxu0 %v3177_v5 }
 0x1e0   :  { %2092 = vmatpush1.bf16.msra.mxu0 %v3175_v6 }
 0x1e1   :  { %2093 = vmatprep.subr.bf16.mxu0 %v3180_v7 }
 0x1e4   :  { %2094 = vmatpush1.bf16.msra.mxu0 %v3178_v8 }
 0x1e5   :  { %2095 = vmatprep.subr.bf16.mxu0 %v3183_v9 }
 0x1e8   :  { %2096 = vmatpush1.bf16.msra.mxu0 %v3181_v10 }
 0x1e9   :  { %2097 = vmatprep.subr.bf16.mxu0 %v3186_v12 }
 0x1ec   :  { %2098 = vmatpush1.bf16.msra.mxu0 %v3184_v13 }
 0x1ed   :  { %2099 = vmatprep.subr.bf16.mxu0 %v3189_v14 }
 0x1f0   :  { %2100 = vmatpush1.bf16.msra.mxu0 %v3187_v15 }
 0x1f1   :  { %2101 = vmatprep.subr.bf16.mxu0 %v3192_v16 }
 0x1f4   :  { %2102 = vmatpush1.bf16.msra.mxu0 %v3190_v19 }
 0x1f5   :  { %2103 = vmatprep.subr.bf16.mxu0 %v3195_v21 }
 0x1f8   :  { %2104 = vmatpush1.bf16.msra.mxu0 %v3193_v22 }
 0x1f9   :  { %2105 = vmatprep.subr.bf16.mxu0 %v3198_v23 }
 0x1fc   :  { %2106 = vmatpush1.bf16.msra.mxu0 %v3196_v24 }
 0x1fd   :  { %2107 = vmatprep.subr.bf16.mxu0 %v3201_v25 }
 0x200   :  { %2108 = vmatpush1.bf16.msra.mxu0 %v3199_v26 }
 0x201   :  { %2109 = vmatprep.subr.bf16.mxu0 %v3204_v27 }
 0x204   :  { %2110 = vmatpush1.bf16.msra.mxu0 %v3202_v28 }
 0x207   :  { %2112 = vmatmul.mubr.bf16.vlgmr.msra.gmra.mrb[4].mxu0 %v1638_v63 }
 0x2da   :  { %v2113_v38 = vpop.f32.mrb[4].mxu0 }
 0x2db   :  { %v2778_v39 = vadd.f32 %v2113_v38, %v1709_v36  ;;  %v2115_v40 = vpop.f32.mrb[5].mxu0 }
 0x2dc   :  { %v2779_v41 = vadd.f32 %v2115_v40, %v1713_v37  ;;  %v2117_v42 = vpop.f32.mrb[6].mxu0 }
 0x2dd   :  { %v2780_v43 = vadd.f32 %v2117_v42, %v1709_v36  ;;  %v2119_v44 = vpop.f32.mrb[7].mxu0  ;;  %v2122_v0 = vmax.f32 %v2778_v39, 0.0 }
 0x2de   :  { %v2781_v45 = vadd.f32 %v2119_v44, %v1713_v37  ;;  %v2123_v47 = vmax.f32 %v2779_v41, 0.0 }
 0x2df   :  { %v2124_v46 = vmax.f32 %v2780_v43, 0.0 }
 0x2e0   :  { %v2125_v48 = vmax.f32 %v2781_v45, 0.0 }
 0x2e1   :  { %v2126_v49 = vpack.c.bf16 %v2124_v46, %v2122_v0 }
 0x2e2   :  { %v2127_v50 = vpack.c.bf16 %v2125_v48, %v2123_v47 }
 0x2e4   :  { %2295 = vmatprep.mubr.bf16.mxu1 %v2127_v50 }
 0x2e5   :  { %2296 = vmatmul.mubr.bf16.vlgmr.msra.gmra.mrb[8].mxu1 %v2126_v49 }
 0x2e6   :  { %2747 = vmatpush3.bf16.msra.mxu1 %v3221_v18  ;;  %2762 = vmatprep.mubr.msk.bf16.mxu1 %vm3285_vm1, %v3284_v34 }
 0x2e7   :  { %2748 = vmatprep.subr.bf16.mxu1 %v3284_v34 }
 0x2ea   :  { %2749 = vmatpush3.bf16.msra.mxu1 %v3222_v17 }
 0x2eb   :  { %2750 = vmatprep.subr.bf16.mxu1 %v3284_v34 }
 0x2ee   :  { %2751 = vmatpush3.bf16.msra.mxu1 %v3223_v20 }
 0x2ef   :  { %2752 = vmatprep.subr.bf16.mxu1 %v3284_v34 }
 0x2f2   :  { %2753 = vmatpush3.bf16.msra.mxu1 %v3224_v51 }
 0x2f3   :  { %2754 = vmatprep.subr.bf16.mxu1 %v3284_v34 }
 0x2f6   :  { %2755 = vmatpush3.bf16.msra.mxu1 %v3225_v11 }
 0x2f7   :  { %2756 = vmatprep.subr.bf16.mxu1 %v3284_v34 }
 0x2fa   :  { %2757 = vmatpush3.bf16.msra.mxu1 %v3226_v52 }
 0x2fb   :  { %2758 = vmatprep.subr.bf16.mxu1 %v3284_v34 }
 0x2fe   :  { %2759 = vmatpush3.bf16.msra.mxu1 %v3227_v53 }
 0x2ff   :  { %2760 = vmatprep.subr.bf16.mxu1 %v3284_v34 }
 0x302   :  { %2761 = vmatpush3.bf16.msra.mxu1 %v3228_v54 }
 0x3b8   :  { %v2731_v55 = vpop.f32.mrb[8].mxu1 }
 0x3b9   :  { %v2732_v57 = vpop.f32.mrb[9].mxu1 }
 0x3ba   :  { %v2733_v58 = vadd.f32 %v2732_v57, %v2731_v55  ;;  %v2734_v59 = vpop.f32.mrb[10].mxu1 }
 0x3bb   :  { %v2735_v60 = vpop.f32.mrb[11].mxu1 }
 0x3bc   :  { %v2298_v61 = vadd.f32 %v2733_v58, %v2689_v56  ;;  %v2736_v62 = vadd.f32 %v2735_v60, %v2734_v59 }
 0x3be   :  { %v2301_v63 = vadd.f32 %v2736_v62, %v2689_v56  ;;  %v2304_v1 = vmax.f32 %v2298_v61, 0.0 }
 0x3c0   :  { %v2305_v2 = vmax.f32 %v2301_v63, 0.0 }
 0x3c2   :  { %v2306_v3 = vpack.c.bf16 %v2305_v2, %v2304_v1 }
 0x3c4   :  { %2763 = vmatmul.mubr.bf16.vlgmr.msra.gmra.mrb[12].mxu1 %v2306_v3 }
 0x497   :  { %v2412_v5 = vpop.f32.mrb[12].mxu1 }
 0x498   :  { %v2413_v6 = vadd.f32 %v2706_v4, %v2412_v5  ;;  %v2764_v7 = vpop.f32.mrb[13].mxu1 }
 0x499   :  { %v2415_v8 = vpop.f32.mrb[14].mxu1 }
 0x49a   :  { %2419 = vst [vmem:[%s3535_s9] sm:$0xff] %v2413_v6  ;;  %v2416_v9 = vadd.f32 %v2706_v4, %v2415_v8  ;;  %v2765_v10 = vpop.f32.mrb[15].mxu1 }
 0x49c   :  { %2420 = vst [vmem:[%s3535_s9 + $0x8] sm:$0xff] %v2416_v9 }
 0x49d   :  { %2425 = vsyncpa [#allocation3], 1 }
 0x49e   :  { %2426 = vsyncpa [#allocation5], 1 }

</bundles_post_ra>
